<compile_context>
chip_gen: v7x
topology: tpu7x:2x2x1
jax: 0.10.0
libtpu: 0.0.40
codegen_flags: <defaults>
</compile_context>

<pallas_src>
import jax
import jax.numpy as jnp
from jax.experimental import pallas as pl
from jax.experimental.pallas import tpu as pltpu

# PyTorch F.normalize clamps the norm at eps; mirror that semantics.
_NORM_EPS = 1e-12


def _sequential_transform_kernel(s_ref, q_ref, w_ref, s_out_ref, q_out_ref, x_ref):
    """Fused MeanCentering -> LinearProjection -> L2Normalization (E episodes).

    s_ref : [E, Ns, D]        support features (VMEM)
    q_ref : [E, Nq, D]        query features   (VMEM)
    w_ref : [D, D]            projection weight (VMEM, bf16, resident across steps)
    x_ref : [E*(Ns+Nq), D]    bf16 VMEM scratch staging the stacked centered operand
    """
    e, ns, d = s_ref.shape
    nq = q_ref.shape[1]
    n_sup = e * ns

    # Elementwise math in f32 (v5e fast path); bf16 only on the MXU operand.
    s = s_ref[...].astype(jnp.float32)                           # [E, Ns, D]
    q = q_ref[...].astype(jnp.float32)                           # [E, Nq, D]

    # --- Transformer 1: MeanCentering (per-episode mean over SUPPORT samples) ---
    mean = jnp.mean(s, axis=1, keepdims=True)                    # [E, 1, D]

    # Stage all centered support + query rows as ONE stacked operand; the
    # f32->bf16 cast is folded into the store (half the VMEM round-trip bytes).
    x_ref[:n_sup, :] = (s - mean).reshape(n_sup, d).astype(x_ref.dtype)
    x_ref[n_sup:, :] = (q - mean).reshape(e * nq, d).astype(x_ref.dtype)

    # --- Transformer 2: LinearProjection (single stacked bf16 MXU matmul,
    #     f32 accumulation; M = E*(Ns+Nq) chosen large enough to fill the MXU) ---
    y = jnp.dot(x_ref[...], w_ref[...],
                preferred_element_type=jnp.float32)              # [E*(Ns+Nq), D]

    # --- Transformer 3: L2Normalization (row-wise, F.normalize semantics) ---
    sumsq = jnp.sum(y * y, axis=-1, keepdims=True)
    inv_norm = jax.lax.rsqrt(jnp.maximum(sumsq, _NORM_EPS * _NORM_EPS))
    y = y * inv_norm

    s_out_ref[...] = y[:n_sup, :].reshape(e, ns, d).astype(s_out_ref.dtype)
    q_out_ref[...] = y[n_sup:, :].reshape(e, nq, d).astype(q_out_ref.dtype)


def _device_vmem_bytes():
    """Physical per-core VMEM; conservative 64 MiB (v7x) fallback if unqueryable."""
    try:
        return int(pltpu.get_tpu_info().vmem_capacity_bytes)
    except Exception:
        return 64 * 1024 * 1024


def _step_vmem_bytes(e, ns, nq, d):
    """Estimated VMEM footprint of one grid step (with double-buffering)."""
    rows = e * (ns + nq)
    feat = rows * d * 4                 # one step's f32 feature bytes (in == out)
    io_blocks = 2 * 2 * feat            # (in + out) feature blocks x double buffer
    weight = 2 * d * d * 2              # resident bf16 weight (+ spare buffer)
    scratch = rows * d * 2              # bf16 stacked-operand scratch
    temps = 6 * feat                    # in-kernel f32 temporaries headroom
    return io_blocks + weight + scratch + temps


def _vmem_limit_bytes(e, ns, nq, d):
    """Shape-derived budget, capped at ~75% of physical VMEM (v7x-safe)."""
    cap = (_device_vmem_bytes() * 3) // 4
    default_scoped = 16 * 1024 * 1024   # platform default scoped-VMEM floor
    return int(min(cap, max(_step_vmem_bytes(e, ns, nq, d), default_scoped)))


def _pick_episodes_per_step(b, ns, nq, d, target_rows=512):
    """Episodes per grid step: ~512 stacked rows (fills a 256-deep MXU and makes
    per-step DMA tiles large), shrunk if the step wouldn't fit in VMEM."""
    rows_per_ep = ns + nq
    e = min(b, max(1, -(-target_rows // rows_per_ep)))
    cap = (_device_vmem_bytes() * 3) // 4
    while e > 1 and _step_vmem_bytes(e, ns, nq, d) > cap:
        e -= 1
    return e


def sequential_feature_transformer(support_features, query_features, weight):
    """Fused forward pass of the sequential feature-transform pipeline.

    Accepts a single episode ([Ns, D], [Nq, D]) or a batch of episodes
    ([B, Ns, D], [B, Nq, D]); `weight` is [D, D] (pre-cast it to bf16 once at
    setup to avoid a per-call cast).  E episodes are packed per grid step.
    """
    single_episode = support_features.ndim == 2
    if single_episode:
        support_features = support_features[None]
        query_features = query_features[None]

    b, ns, d = support_features.shape
    _, nq, _ = query_features.shape

    # bf16 weight for the MXU; cast only if the caller didn't pre-cast (hoist).
    w_bf16 = weight if weight.dtype == jnp.bfloat16 else weight.astype(jnp.bfloat16)

    e = _pick_episodes_per_step(b, ns, nq, d)
    b_pad = ((b + e - 1) // e) * e
    if b_pad != b:
        pad = b_pad - b
        # Zero-padded episodes are benign: mean=0, projection=0, norm clamps at eps.
        support_features = jnp.pad(support_features, ((0, pad), (0, 0), (0, 0)))
        query_features = jnp.pad(query_features, ((0, pad), (0, 0), (0, 0)))

    # Weight: constant index_map -> resident in VMEM across all grid steps.
    # For large D (only a concern on v7x's 64 MiB VMEM), keep a single buffer so
    # default double-buffering doesn't reserve a duplicate D^2 bf16 copy.
    if d * d * 2 >= (8 << 20):
        w_spec = pl.BlockSpec((d, d), lambda i: (0, 0), pipeline_mode=pl.Buffered(1))
    else:
        w_spec = pl.BlockSpec((d, d), lambda i: (0, 0))

    s_out, q_out = pl.pallas_call(
        _sequential_transform_kernel,
        out_shape=(
            jax.ShapeDtypeStruct((b_pad, ns, d), support_features.dtype),
            jax.ShapeDtypeStruct((b_pad, nq, d), query_features.dtype),
        ),
        grid=(b_pad // e,),
        in_specs=[
            pl.BlockSpec((e, ns, d), lambda i: (i, 0, 0)),
            pl.BlockSpec((e, nq, d), lambda i: (i, 0, 0)),
            w_spec,
        ],
        out_specs=(
            pl.BlockSpec((e, ns, d), lambda i: (i, 0, 0)),
            pl.BlockSpec((e, nq, d), lambda i: (i, 0, 0)),
        ),
        scratch_shapes=[pltpu.VMEM((e * (ns + nq), d), jnp.bfloat16)],
        compiler_params=pltpu.CompilerParams(
            dimension_semantics=("parallel",),   # episode axis: shard across v7x's 2 TCs
            vmem_limit_bytes=_vmem_limit_bytes(e, ns, nq, d),
        ),
    )(support_features, query_features, w_bf16)

    if b_pad != b:
        s_out = s_out[:b]
        q_out = q_out[:b]
    if single_episode:
        return s_out[0], q_out[0]
    return s_out, q_out


# ----------------------------- references -----------------------------------

def _l2_normalize(x):
    norm = jnp.sqrt(jnp.sum(x * x, axis=-1, keepdims=True))
    return x / jnp.maximum(norm, _NORM_EPS)


def _reference_f32(support, query, weight):
    """Pure-f32 reference of the same sequential pipeline (torch-equivalent)."""
    s = support.astype(jnp.float32)
    q = query.astype(jnp.float32)
    w = weight.astype(jnp.float32)
    mean = jnp.mean(s, axis=-2, keepdims=True)
    s, q = s - mean, q - mean
    s, q = s @ w, q @ w
    return _l2_normalize(s), _l2_normalize(q)


def _reference_kernel_precision(support, query, weight):
    """Mirrors the kernel's numerics (f32 centering, bf16 matmul, f32 acc)."""
    s = support.astype(jnp.float32)
    q = query.astype(jnp.float32)
    w = weight.astype(jnp.bfloat16)
    mean = jnp.mean(s, axis=-2, keepdims=True)
    proj = lambda x: jnp.dot((x - mean).astype(jnp.bfloat16), w,
                             preferred_element_type=jnp.float32)
    return _l2_normalize(proj(s)), _l2_normalize(proj(q))


if __name__ == "__main__":
    key = jax.random.PRNGKey(0)
    k_s, k_q, k_w = jax.random.split(key, 3)

    # Small shapes; batch chosen so the run exercises multi-step grids AND the
    # episode-batching / tail-padding path (E ~ 22 episodes per step here).
    batch, n_support, n_query, d = 30, 16, 8, 128
    support = jax.random.normal(k_s, (batch, n_support, d), dtype=jnp.float32)
    query = jax.random.normal(k_q, (batch, n_query, d), dtype=jnp.float32)
    # Deterministic "learned" projection weight (synthetic init, no checkpoint).
    weight = jax.random.normal(k_w, (d, d), dtype=jnp.float32) * (1.0 / d ** 0.5)
    # Hoisted one-time bf16 cast (what a caller would do at parameter setup).
    weight_bf16 = weight.astype(jnp.bfloat16)

    # Batched episodes: E episodes per grid step, weight resident in VMEM.
    s_out, q_out = sequential_feature_transformer(support, query, weight_bf16)
    jax.block_until_ready((s_out, q_out))

    # Tight check against a reference at the kernel's (bf16-matmul) precision.
    s_kp, q_kp = _reference_kernel_precision(support, query, weight)
    assert jnp.allclose(s_out, s_kp, atol=1e-3, rtol=1e-3)
    assert jnp.allclose(q_out, q_kp, atol=1e-3, rtol=1e-3)

    # Loose check against the pure-f32 pipeline (small bf16 drift expected).
    s_f32, q_f32 = _reference_f32(support, query, weight)
    assert jnp.allclose(s_out, s_f32, atol=2e-2, rtol=2e-2)
    assert jnp.allclose(q_out, q_f32, atol=2e-2, rtol=2e-2)

    # Single-episode (2-D) calling convention reuses the same kernel.
    s_one, q_one = sequential_feature_transformer(support[0], query[0], weight_bf16)
    jax.block_until_ready((s_one, q_one))
    assert jnp.allclose(s_one, s_out[0], atol=1e-5, rtol=1e-5)
    assert jnp.allclose(q_one, q_out[0], atol=1e-5, rtol=1e-5)

    print("KERNEL_OK")
</pallas_src>

<mosaic_0001>
module attributes {stable_mosaic.version = 11 : i64} {
  func.func @_sequential_transform_kernel(%arg0: i32, %arg1: memref<22x16x128xf32, #tpu.memory_space<vmem>>, %arg2: memref<22x8x128xf32, #tpu.memory_space<vmem>>, %arg3: memref<128x128xbf16, #tpu.memory_space<vmem>>, %arg4: memref<22x16x128xf32, #tpu.memory_space<vmem>>, %arg5: memref<22x8x128xf32, #tpu.memory_space<vmem>>, %arg6: memref<528x128xbf16, #tpu.memory_space<vmem>>) attributes {dimension_semantics = [#tpu.dimension_semantics<parallel>], iteration_bounds = array<i64: 2>, scalar_prefetch = 0 : i64, scratch_operands = 1 : i64, tpu.core_type = #tpu.core_type<tc>, window_params = [{transform_indices = @transform_0, window_bounds = array<i64: 22, 16, 128>}, {transform_indices = @transform_1, window_bounds = array<i64: 22, 8, 128>}, {pipeline_mode = #tpu.pipeline_mode<synchronous>, transform_indices = @transform_2, window_bounds = array<i64: 128, 128>}, {transform_indices = @transform_3, window_bounds = array<i64: 22, 16, 128>}, {transform_indices = @transform_4, window_bounds = array<i64: 22, 8, 128>}]} {
    %c0 = arith.constant 0 : index
    %c0_0 = arith.constant 0 : index
    %c0_1 = arith.constant 0 : index
    %0 = vector.load %arg1[%c0, %c0_0, %c0_1] : memref<22x16x128xf32, #tpu.memory_space<vmem>>, vector<22x16x128xf32>
    %c0_2 = arith.constant 0 : index
    %c0_3 = arith.constant 0 : index
    %c0_4 = arith.constant 0 : index
    %1 = vector.load %arg2[%c0_2, %c0_3, %c0_4] : memref<22x8x128xf32, #tpu.memory_space<vmem>>, vector<22x8x128xf32>
    %cst = arith.constant dense<0.000000e+00> : vector<22x128xf32>
    %2 = vector.multi_reduction <add>, %0, %cst [1] : vector<22x16x128xf32> to vector<22x128xf32>
    %3 = vector.shape_cast %2 : vector<22x128xf32> to vector<22x1x128xf32>
    %cst_5 = arith.constant 1.600000e+01 : f32
    %4 = vector.broadcast %cst_5 : f32 to vector<22x1x128xf32>
    %5 = arith.divf %3, %4 : vector<22x1x128xf32>
    %6 = vector.broadcast %5 : vector<22x1x128xf32> to vector<22x16x128xf32>
    %7 = arith.subf %0, %6 : vector<22x16x128xf32>
    %8 = vector.shape_cast %7 : vector<22x16x128xf32> to vector<352x128xf32>
    %9 = arith.truncf %8 : vector<352x128xf32> to vector<352x128xbf16>
    %c0_6 = arith.constant 0 : index
    %c0_7 = arith.constant 0 : index
    %10 = vector.load %arg6[%c0_6, %c0_7] : memref<528x128xbf16, #tpu.memory_space<vmem>>, vector<352x128xbf16>
    tpu.vector_store %arg6[%c0_6, %c0_7], %9 {strides = array<i32>} : memref<528x128xbf16, #tpu.memory_space<vmem>>, vector<352x128xbf16>,
    %11 = vector.broadcast %5 : vector<22x1x128xf32> to vector<22x8x128xf32>
    %12 = arith.subf %1, %11 : vector<22x8x128xf32>
    %13 = vector.shape_cast %12 : vector<22x8x128xf32> to vector<176x128xf32>
    %14 = arith.truncf %13 : vector<176x128xf32> to vector<176x128xbf16>
    %c352 = arith.constant 352 : index
    %c0_8 = arith.constant 0 : index
    %15 = vector.load %arg6[%c352, %c0_8] : memref<528x128xbf16, #tpu.memory_space<vmem>>, vector<176x128xbf16>
    tpu.vector_store %arg6[%c352, %c0_8], %14 {strides = array<i32>} : memref<528x128xbf16, #tpu.memory_space<vmem>>, vector<176x128xbf16>,
    %c0_9 = arith.constant 0 : index
    %c0_10 = arith.constant 0 : index
    %16 = vector.load %arg6[%c0_9, %c0_10] : memref<528x128xbf16, #tpu.memory_space<vmem>>, vector<528x128xbf16>
    %c0_11 = arith.constant 0 : index
    %c0_12 = arith.constant 0 : index
    %17 = vector.load %arg3[%c0_11, %c0_12] : memref<128x128xbf16, #tpu.memory_space<vmem>>, vector<128x128xbf16>
    %cst_13 = arith.constant dense<0.000000e+00> : vector<528x128xf32>
    %18 = tpu.matmul %16, %17, %cst_13 {dimension_numbers = #tpu.dot_dimension_numbers<[1], [0], [0], [1], [0, 0, 1, 1], [], []>} : vector<528x128xbf16>, vector<128x128xbf16>, vector<528x128xf32> -> vector<528x128xf32>
    %19 = arith.mulf %18, %18 : vector<528x128xf32>
    %cst_14 = arith.constant dense<0.000000e+00> : vector<528xf32>
    %20 = vector.multi_reduction <add>, %19, %cst_14 [1] : vector<528x128xf32> to vector<528xf32>
    %21 = vector.shape_cast %20 : vector<528xf32> to vector<528x1xf32>
    %cst_15 = arith.constant 1.000000e-24 : f32
    %22 = vector.broadcast %cst_15 : f32 to vector<528x1xf32>
    %23 = arith.maximumf %21, %22 : vector<528x1xf32>
    %24 = math.rsqrt %23 : vector<528x1xf32>
    %25 = vector.broadcast %24 : vector<528x1xf32> to vector<528x128xf32>
    %26 = arith.mulf %18, %25 : vector<528x128xf32>
    %27 = vector.extract_strided_slice %26 {offsets = [0, 0], sizes = [352, 128], strides = [1, 1]} : vector<528x128xf32> to vector<352x128xf32>
    %28 = vector.shape_cast %27 : vector<352x128xf32> to vector<22x16x128xf32>
    %c0_16 = arith.constant 0 : index
    %c0_17 = arith.constant 0 : index
    %c0_18 = arith.constant 0 : index
    %29 = vector.load %arg4[%c0_16, %c0_17, %c0_18] : memref<22x16x128xf32, #tpu.memory_space<vmem>>, vector<22x16x128xf32>
    tpu.vector_store %arg4[%c0_16, %c0_17, %c0_18], %28 {strides = array<i32>} : memref<22x16x128xf32, #tpu.memory_space<vmem>>, vector<22x16x128xf32>,
    %30 = vector.extract_strided_slice %26 {offsets = [352, 0], sizes = [176, 128], strides = [1, 1]} : vector<528x128xf32> to vector<176x128xf32>
    %31 = vector.shape_cast %30 : vector<176x128xf32> to vector<22x8x128xf32>
    %c0_19 = arith.constant 0 : index
    %c0_20 = arith.constant 0 : index
    %c0_21 = arith.constant 0 : index
    %32 = vector.load %arg5[%c0_19, %c0_20, %c0_21] : memref<22x8x128xf32, #tpu.memory_space<vmem>>, vector<22x8x128xf32>
    tpu.vector_store %arg5[%c0_19, %c0_20, %c0_21], %31 {strides = array<i32>} : memref<22x8x128xf32, #tpu.memory_space<vmem>>, vector<22x8x128xf32>,
    return
  }
  func.func @transform_0(%arg0: i32) -> (i32, i32, i32) {
    %c0_i32 = arith.constant 0 : i32
    %c0_i32_0 = arith.constant 0 : i32
    %c0_i32_1 = arith.constant 0 : i32
    return %arg0, %c0_i32, %c0_i32_0 : i32, i32, i32
  }
  func.func @transform_1(%arg0: i32) -> (i32, i32, i32) {
    %c0_i32 = arith.constant 0 : i32
    %c0_i32_0 = arith.constant 0 : i32
    %c0_i32_1 = arith.constant 0 : i32
    return %arg0, %c0_i32, %c0_i32_0 : i32, i32, i32
  }
  func.func @transform_2(%arg0: i32) -> (i32, i32) {
    %c0_i32 = arith.constant 0 : i32
    %c0_i32_0 = arith.constant 0 : i32
    %c0_i32_1 = arith.constant 0 : i32
    return %c0_i32, %c0_i32_0 : i32, i32
  }
  func.func @transform_3(%arg0: i32) -> (i32, i32, i32) {
    %c0_i32 = arith.constant 0 : i32
    %c0_i32_0 = arith.constant 0 : i32
    %c0_i32_1 = arith.constant 0 : i32
    return %arg0, %c0_i32, %c0_i32_0 : i32, i32, i32
  }
  func.func @transform_4(%arg0: i32) -> (i32, i32, i32) {
    %c0_i32 = arith.constant 0 : i32
    %c0_i32_0 = arith.constant 0 : i32
    %c0_i32_1 = arith.constant 0 : i32
    return %arg0, %c0_i32, %c0_i32_0 : i32, i32, i32
  }
}

</mosaic_0001>

<bundles_post_ra>
// kernel: tpu_custom_call.1
= control target key start
LH: loop header
LB: loop body
LE: loop exit
PB: predicated region body
PF: predicated region fallthrough
CT: control target
= control target key end

     0   :  { %s3472_s0 = inlined_call_operand.hbm [shape: f32[44,16,128], index: 0, kind: input, shape index: {}]   ;;  %s3473_s1 = inlined_call_operand.hbm [shape: f32[44,8,128], index: 1, kind: input, shape index: {}]   ;;  %s3474_s2 = inlined_call_operand.hbm [shape: bf16[128,128], index: 2, kind: input, shape index: {}]   ;;  %s3475_s3 = inlined_call_operand.hbm [shape: f32[44,16,128], index: 3, kind: output, shape index: {0}]   ;;  %s3476_s4 = inlined_call_operand.hbm [shape: f32[44,8,128], index: 4, kind: output, shape index: {1}]  }
   0x1   :  { %3497 = sst [smem:[#allocation34_spill]] %s3472_s0 }
   0x2   :  { %3498 = sst [smem:[#allocation35_spill]] %s3474_s2 }
   0x3   :  { %10 = vsyncpa [#allocation4], 0 }
   0x4   :  { %12 = vsyncpa [#allocation4 + $0x1], 0 }
   0x5   :  { %13 = vsyncpa [#allocation7], 0 }
   0x6   :  { %15 = vsyncpa [#allocation7 + $0x1], 0 }
   0x7   :  { %16 = vsyncpa [#allocation5], 0 }
   0x8   :  { %18 = vsyncpa [#allocation5 + $0x1], 0 }
   0x9   :  { %19 = vsyncpa [#allocation11], 0 }
   0xa   :  { %21 = vsyncpa [#allocation11 + $0x1], 0  ;;  %s2379_s15 = smov 0   ;;  %s2381_s16 = smov 0  }
   0xb   :  { %s2383_s17 = smov 0   ;;  %s2385_s18 = smov 0  }
   0xc LB: > { %s2400_s19 = sadd.s32 4294967295, %s2339_s18   ;;  %s1691_s20 = sadd.s32 4294967294, %s2339_s18   ;;  %s2339_s18 = sphi %s2385_s18, %s3551_s18   ;;  %s2335_s17 = sphi %s2383_s17, %s3550_s17   ;;  %s2331_s16 = sphi %s2381_s16, %s3549_s16   ;;  %s2327_s15 = sphi %s2379_s15, %s3548_s15  }
   0xd   : > { %p47_p0 = scmp.ne.s32.totalorder %s2331_s16, %s2327_s15  ;;  %p3477_p1 = scmp.eq.s32.totalorder %s2400_s19, 0 }
   0xe   : > { %p124_p3 = scmp.eq.s32.totalorder %s1691_s20, 1  ;;  %p1692_p5 = scmp.ge.s32.totalorder %s2339_s18, 1 }
   0xf   : > { %p2409_p4 = por %p3477_p1, %p47_p0  ;;  %p157_p7 = scmp.lt.s32.totalorder %s2339_s18, 3 }
  0x10   : > { %p2414_p6 = por %p124_p3, %p47_p0  ;;  %s2341_s24 = smov [#allocation8]  }
  0x11   : > { %s3499_s21 = scalar_select %p2409_p4, 1, 0 }
  0x12   : > { %s3500_s22 = scalar_select %p2414_p6, 1, 0 }
  0x13   : > { %p2419_p8 = pnand %p1692_p5, %p157_p7  ;;  %s169_s25 = sshll.u32 %s2341_s24, 4  ;;  %s2423_s25 = int_to_ptr.vmem [resolvable:$true] %s169_s25 }
  0x14   : > { %s2435_s27 = sadd.s32 1, %s2339_s18   ;;  %s34_s28 = sadd.s32 1, %s2335_s17 }
  0x15   : > { %s3501_s23 = scalar_select %p2419_p8, 1, 0 }
  0x16   : > { %p1942_p9 = pneg %p2419_p8  ;;  %s31_s29 = ssub.s32 %s2339_s18, %s2435_s27 }
  0x17   : > { %s3503_s2 = sld [smem:[#allocation35_spill]] }
  0x18   : > { %p2430_p11 = pnand %p1942_p9, %p3477_p1 }
  0x1a   : > { %p2147_p13 = pneg %p2430_p11 }
  0x1d   : > { %s2145_s6 = scalar_lea.hbm %s3503_s2, 1024 }
  0x1e   : > { %p2146_p12 = scmp.ne.s32.totalorder %s3503_s2, %s2145_s6  ;;  %p2152_p5 = scmp.lt.u32.totalorder %s2145_s6, %s3503_s2 }
  0x20   : > { %p2148_p0 = pnand %p2147_p13, %p2146_p12 }
  0x22   : > { %p2149_p3 = pneg %p2148_p0 }
  0x24   : > { %p2154_p7 = pnand %p2152_p5, %p2149_p3 }
  0x26   : > { %2157 = shalt.err (!%p2154_p7)
}
  0x27   : > { %s2158_s11 = scalar_lea.vmem %s2423_s25, 1024  ;;  %p2166_p2 = scmp.lt.s32.totalorder %s2423_s25, %s2423_s25 }
  0x28   : > { %p2159_p9 = scmp.ne.s32.totalorder %s2423_s25, %s2158_s11  ;;  %p2167_p6 = scmp.lt.s32.totalorder %s2158_s11, %s2158_s11 }
  0x2a   : > { %p2161_p10 = pnand %p2159_p9, %p2147_p13  ;;  %p2168_p4 = por %p2167_p6, %p2166_p2 }
  0x2c   : > { %p2162_p1 = pneg %p2161_p10 }
  0x2e   : > { %p2169_p8 = pnand %p2168_p4, %p2162_p1 }
  0x30   : > { %2172 = shalt.err (!%p2169_p8)
}
  0x31   : > { %s2342_s12 = smov 64   ;;  %s2343_s13 = smov 4  }
  0x32   : > { %1945 = dma.hbm_to_vmem [thread:$0]  (!%p2430_p11), %s3503_s2, 1024, %s2423_s25, [#allocation7], %s2342_s12, %s2342_s12, %s2343_s13  }
  0x33   : > { %p32_p2 = scmp.eq.s32.totalorder %s31_s29, 0  ;;  %p41_p1 = scmp.ne.s32.totalorder %s2335_s17, %s2331_s16 }
  0x34   : > { %p42_p4 = scmp.eq.s32.totalorder %s2339_s18, 0  ;;  %p1961_p6 = scmp.lt.s32.totalorder %s2339_s18, 2 }
  0x35   : > { %s2466_s24 = scalar_select %p32_p2, %s2335_s17, %s34_s28  }
  0x36   : > { %p43_p8 = por %p42_p4, %p41_p1  ;;  %p3504_p10 = scmp.eq.s32.totalorder %s2400_s19, 1 }
  0x37   : > { %s2475_s5 = sand.u32 1, %s2335_s17   ;;  %s1719_s26 = smul.u32 5632, %s2339_s18 }
  0x38   : > { %p2470_p12 = por %p3504_p10, %p41_p1  ;;  %s1926_s6 = smul.u32 352, %s2475_s5 }
  0x39   : > { %s3506_s0 = sld [smem:[#allocation34_spill]]  ;;  %p2484_p11 = pnand %p1961_p6, %p43_p8 }
  0x3a   : > { %s187_s8 = scalar_lea.vmem [#allocation3], %s1926_s6  ;;  %s184_s10 = scalar_lea.sflag [#allocation4], %s2475_s5 }
  0x3b   : > { %s195_s9 = sshll.u32 %s187_s8, 4  ;;  %p2175_p0 = pneg %p2484_p11  ;;  %s2488_s9 = int_to_ptr.vmem [resolvable:$true] %s195_s9 }
  0x3f   : > { %s2482_s29 = scalar_lea.hbm %s3506_s0, %s1719_s26  ;;  %s2178_s14 = scalar_lea.hbm %s3506_s0, 11264 }
  0x40   : > { %s2173_s11 = scalar_lea.hbm %s2482_s29, 5632  ;;  %p2179_p7 = scmp.lt.u32.totalorder %s2482_s29, %s3506_s0 }
  0x41   : > { %p2174_p13 = scmp.ne.s32.totalorder %s2482_s29, %s2173_s11  ;;  %p2180_p9 = scmp.lt.u32.totalorder %s2178_s14, %s2173_s11 }
  0x42   : > { %p2182_p1 = scmp.lt.u32.totalorder %s2173_s11, %s2482_s29 }
  0x43   : > { %p2176_p3 = pnand %p2175_p0, %p2174_p13  ;;  %p2181_p2 = por %p2180_p9, %p2179_p7 }
  0x45   : > { %p2177_p5 = pneg %p2176_p3  ;;  %p2183_p4 = por %p2182_p1, %p2181_p2 }
  0x47   : > { %p2184_p6 = pnand %p2183_p4, %p2177_p5 }
  0x49   : > { %2187 = shalt.err (!%p2184_p6)
}
  0x4a   : > { %s2188_s6 = scalar_lea.vmem %s2488_s9, 5632  ;;  %s2344_s7 = smov [#allocation3]  }
  0x4b   : > { %p2189_p8 = scmp.ne.s32.totalorder %s2488_s9, %s2188_s6  ;;  %s2193_s25 = sshll.u32 %s2344_s7, 4  ;;  %s2194_s25 = int_to_ptr.vmem [resolvable:$false] %s2193_s25 }
  0x4c   : > { %s2195_s8 = scalar_lea.vmem %s2194_s25, 11264  ;;  %p2196_p3 = scmp.lt.s32.totalorder %s2488_s9, %s2194_s25 }
  0x4d   : > { %p2191_p10 = pnand %p2189_p8, %p2175_p0  ;;  %p2197_p7 = scmp.lt.s32.totalorder %s2195_s8, %s2188_s6 }
  0x4f   : > { %p2192_p13 = pneg %p2191_p10  ;;  %p2198_p9 = por %p2197_p7, %p2196_p3 }
  0x51   : > { %p2199_p2 = pnand %p2198_p9, %p2192_p13 }
  0x53   : > { %2202 = shalt.err (!%p2199_p2)
}
  0x54   : > { %s2345_s11 = smov 128   ;;  %s2346_s12 = smov 8  }
  0x55   : > { %1949 = dma.hbm_to_vmem [thread:$0]  (!%p2484_p11), %s2482_s29, 5632, %s2488_s9, %s184_s10, %s2345_s11, %s2345_s11, %s2346_s12  }
  0x56   : > { %s205_s13 = sand.u32 1, %s2339_s18   ;;  %s1927_s14 = smul.u32 176, %s2475_s5 }
  0x57   : > { %s1715_s20 = smul.u32 2816, %s2339_s18  ;;  %s2531_s0 = scalar_lea.sflag [#allocation7], %s205_s13 }
  0x58   : > { %s209_s25 = scalar_lea.vmem [#allocation6], %s1927_s14  ;;  %s2208_s9 = scalar_lea.hbm %s3473_s1, 5632 }
  0x59   : > { %s2527_s7 = scalar_lea.hbm %s3473_s1, %s1715_s20  ;;  %s216_s8 = sshll.u32 %s209_s25, 4  ;;  %s2529_s8 = int_to_ptr.vmem [resolvable:$true] %s216_s8 }
  0x5a   : > { %s2203_s2 = scalar_lea.hbm %s2527_s7, 2816  ;;  %p2209_p6 = scmp.lt.u32.totalorder %s2527_s7, %s3473_s1 }
  0x5b   : > { %p2204_p5 = scmp.ne.s32.totalorder %s2527_s7, %s2203_s2  ;;  %p2210_p8 = scmp.lt.u32.totalorder %s2208_s9, %s2203_s2 }
  0x5c   : > { %p2212_p13 = scmp.lt.u32.totalorder %s2203_s2, %s2527_s7 }
  0x5d   : > { %p2206_p1 = pnand %p2204_p5, %p2175_p0  ;;  %p2211_p10 = por %p2210_p8, %p2209_p6 }
  0x5f   : > { %p2207_p4 = pneg %p2206_p1  ;;  %p2213_p3 = por %p2212_p13, %p2211_p10 }
  0x61   : > { %p2214_p7 = pnand %p2213_p3, %p2207_p4 }
  0x63   : > { %2217 = shalt.err (!%p2214_p7)
}
  0x64   : > { %s2218_s13 = scalar_lea.vmem %s2529_s8, 2816  ;;  %s2347_s14 = smov [#allocation6]  }
  0x65   : > { %p2219_p9 = scmp.ne.s32.totalorder %s2529_s8, %s2218_s13  ;;  %s2223_s26 = sshll.u32 %s2347_s14, 4  ;;  %s2224_s26 = int_to_ptr.vmem [resolvable:$false] %s2223_s26 }
  0x66   : > { %s2225_s6 = scalar_lea.vmem %s2224_s26, 5632  ;;  %p2226_p1 = scmp.lt.s32.totalorder %s2529_s8, %s2224_s26 }
  0x67   : > { %p2221_p2 = pnand %p2219_p9, %p2175_p0  ;;  %p2227_p6 = scmp.lt.s32.totalorder %s2225_s6, %s2218_s13 }
  0x69   : > { %p2222_p5 = pneg %p2221_p2  ;;  %p2228_p8 = por %p2227_p6, %p2226_p1 }
  0x6b   : > { %p2229_p10 = pnand %p2228_p8, %p2222_p5 }
  0x6d   : > { %2232 = shalt.err (!%p2229_p10)
}
  0x6e   : > { %1952 = dma.hbm_to_vmem [thread:$0]  (!%p2484_p11), %s2527_s7, 2816, %s2529_s8, %s2531_s0, %s2345_s11, %s2345_s11, %s2346_s12  }
  0x6f   : > { %p3508_p0 = scmp.ne.s32.totalorder %s3501_s23, 0 }
  0x71   : > { %228 = sbr.rel (%p3508_p0) target bundleno = 706 (0x2c2), region = 32 }
  0x78   : > { %s2563_s2 = sand.u32 1, %s2331_s16   ;;  %p3509_p4 = scmp.ne.s32.totalorder %s3499_s21, 0 }
  0x79   : > { %s1928_s25 = smul.u32 352, %s2563_s2  ;;  %s231_s5 = scalar_lea.sflag [#allocation4], %s2563_s2 }
  0x7b   : > { %s2569_s28 = scalar_lea.vmem [#allocation3], %s1928_s25 }
  0x7c   : > { %2306 = dma.done.wait (%p3509_p4), %s231_s5, 5632  }
  0x7d   : > { %2308 = vsyncadd (%p3509_p4), %s231_s5, 4294961664  ;;  %s239_s0 = sand.u32 1, %s2400_s19   ;;  %s1929_s23 = smul.u32 176, %s2563_s2 }
  0x7e   : > { %s240_s11 = scalar_lea.sflag [#allocation7], %s239_s0 }
  0x7f   : > { %s2579_s12 = scalar_lea.vmem [#allocation6], %s1929_s23 }
  0x80   : > { %2310 = dma.done.wait (%p3509_p4), %s240_s11, 2816  }
  0x81   : > { %2312 = vsyncadd (%p3509_p4), %s240_s11, 4294964480  ;;  %p3510_p11 = scmp.eq.s32.totalorder %s2400_s19, 0 }
  0x83   : > { %2314 = dma.done.wait (%p3510_p11), [#allocation7], 1024   ;;  %p3511_p13 = pmov %p3510_p11 }
  0x84   : > { %v2348_v0 = vmov 0.0   ;;  %vm2349_vm0 = vmmov 0   ;;  %v2005_v1 = vld [vmem:[#allocation8] sm:$0xff]   ;;  %v2006_v2 = vld [vmem:[#allocation8 + $0x8] sm:$0xff]   ;;  %v2007_v3 = vld [vmem:[#allocation8 + $0x10] sm:$0xff]   ;;  %s3241_s21 = scalar_lea.vmem [#allocation9], %s1928_s25 }
  0x85   : > { %2316 = vsyncadd (%p3511_p13), [#allocation7], 4294966272  ;;  %1762 = vmatprep.subr.bf16.mxu0 %v2348_v0  ;;  %1910 = vmatprep.subr.bf16.mxu1 %v2348_v0  ;;  %v2008_v4 = vld [vmem:[#allocation8 + $0x18] sm:$0xff]   ;;  %v2600_v5 = vld [vmem:[%s2569_s28] sm:$0xff]  ;;  %s3288_s7 = scalar_lea.vmem [#allocation10], %s1929_s23  ;;  %s1720_s8 = smul.u32 5632, %s2400_s19 }
  0x86   : > { %1778 = vmatprep.mubr.msk.bf16.mxu0 %vm2349_vm0, %v2348_v0  ;;  %1846 = vmatprep.mubr.msk.bf16.mxu1 %vm2349_vm0, %v2348_v0  ;;  %v2603_v6 = vld [vmem:[%s2569_s28 + $0x8] sm:$0xff]  ;;  %v2606_v7 = vld [vmem:[%s2569_s28 + $0x110] sm:$0xff]  ;;  %v2611_v9 = vld [vmem:[%s2569_s28 + $0x118] sm:$0xff]  ;;  %s1538_s29 = sshll.u32 %s3241_s21, 4  ;;  %s1718_s13 = smul.u32 2816, %s2400_s19  ;;  %s3378_s29 = int_to_ptr.vmem [resolvable:$true] %s1538_s29 }
  0x87   : > { %1763 = vmatpush3.bf16.msra.mxu0 %v2005_v1  ;;  %1918 = vmatpush3.bf16.msra.mxu1 %v2005_v1  ;;  %v353_v8 = vadd.f32 %v2603_v6, %v2600_v5  ;;  %v2614_v10 = vld [vmem:[%s2569_s28 + $0x10] sm:$0xff]  ;;  %v2617_v11 = vld [vmem:[%s2569_s28 + $0x18] sm:$0xff]  ;;  %v472_v12 = vadd.f32 %v2611_v9, %v2606_v7  ;;  %v2624_v14 = vld [vmem:[%s2569_s28 + $0x120] sm:$0xff]  ;;  %s3376_s20 = scalar_lea.hbm %s3475_s3, %s1720_s8  ;;  %s1554_s14 = sshll.u32 %s3288_s7, 4  ;;  %s3424_s14 = int_to_ptr.vmem [resolvable:$true] %s1554_s14 }
  0x88   : > { %1764 = vmatprep.subr.bf16.mxu0 %v2348_v0  ;;  %1911 = vmatprep.subr.bf16.mxu1 %v2348_v0  ;;  %v360_v13 = vadd.f32 %v2617_v11, %v2614_v10  ;;  %v2627_v15 = vld [vmem:[%s2569_s28 + $0x128] sm:$0xff]  ;;  %v2630_v16 = vld [vmem:[%s2569_s28 + $0x20] sm:$0xff]  ;;  %v2640_v20 = vld [vmem:[%s2569_s28 + $0x130] sm:$0xff]  ;;  %s1519_s26 = scalar_lea.sflag [#allocation5], %s2563_s2  ;;  %s2233_s6 = scalar_lea.vmem %s3378_s29, 5632 }
  0x89   : > { %v354_v17 = vrot.slane %v353_v8, 4  ;;  %v479_v18 = vadd.f32 %v2627_v15, %v2624_v14  ;;  %v2637_v19 = vld [vmem:[%s2569_s28 + $0x28] sm:$0xff]  ;;  %v2643_v21 = vld [vmem:[%s2569_s28 + $0x138] sm:$0xff]  ;;  %v473_v22 = vrot.slane %v472_v12, 4  ;;  %v2650_v26 = vld [vmem:[%s2569_s28 + $0x30] sm:$0xff]  ;;  %p2234_p3 = scmp.ne.s32.totalorder %s3378_s29, %s2233_s6  ;;  %s2350_s25 = smov [#allocation9]  }
  0x8a   : > { %v361_v23 = vrot.slane %v360_v13, 4  ;;  %v367_v24 = vadd.f32 %v2637_v19, %v2630_v16  ;;  %v486_v25 = vadd.f32 %v2643_v21, %v2640_v20  ;;  %v2653_v27 = vld [vmem:[%s2569_s28 + $0x38] sm:$0xff]  ;;  %v2656_v28 = vld [vmem:[%s2569_s28 + $0x140] sm:$0xff]  ;;  %v2661_v32 = vld [vmem:[%s2569_s28 + $0x148] sm:$0xff]  ;;  %s2237_s5 = sshll.u32 %s2350_s25, 4  ;;  %s2238_s5 = int_to_ptr.vmem [resolvable:$false] %s2237_s5 }
  0x8b   : > { %1765 = vmatpush3.bf16.msra.mxu0 %v2006_v2  ;;  %1919 = vmatpush3.bf16.msra.mxu1 %v2006_v2  ;;  %v355_v29 = vadd.f32 %v354_v17, %v353_v8  ;;  %v480_v30 = vrot.slane %v479_v18, 4  ;;  %v374_v31 = vadd.f32 %v2653_v27, %v2650_v26  ;;  %v2009_v33 = vld [vmem:[#allocation8 + $0x20] sm:$0xff]   ;;  %v474_v34 = vadd.f32 %v473_v22, %v472_v12  ;;  %v2010_v47 = vld [vmem:[#allocation8 + $0x28] sm:$0xff]   ;;  %v2011_v60 = vld [vmem:[#allocation8 + $0x30] sm:$0xff]   ;;  %p2235_p7 = pnand %p2234_p3, %p2470_p12  ;;  %p2240_p2 = scmp.lt.s32.totalorder %s3378_s29, %s2238_s5 }
  0x8c   : > { %1766 = vmatprep.subr.bf16.mxu0 %v2348_v0  ;;  %1912 = vmatprep.subr.bf16.mxu1 %v2348_v0  ;;  %v362_v35 = vadd.f32 %v361_v23, %v360_v13  ;;  %v368_v36 = vrot.slane %v367_v24, 4  ;;  %v487_v37 = vrot.slane %v486_v25, 4  ;;  %v493_v40 = vadd.f32 %v2661_v32, %v2656_v28 }
  0x8d   : > { %v356_v38 = vrot.slane %v355_v29, 2  ;;  %v481_v39 = vadd.f32 %v480_v30, %v479_v18  ;;  %v475_v41 = vrot.slane %v474_v34, 2  ;;  %v375_v50 = vrot.slane %v374_v31, 4  ;;  %v2012_v18 = vld [vmem:[#allocation8 + $0x38] sm:$0xff]   ;;  %p2236_p9 = pneg %p2235_p7 }
  0x8e   : > { %v363_v42 = vrot.slane %v362_v35, 2  ;;  %v369_v43 = vadd.f32 %v368_v36, %v367_v24  ;;  %v488_v44 = vadd.f32 %v487_v37, %v486_v25  ;;  %v494_v54 = vrot.slane %v493_v40, 4  ;;  %v2686_v25 = vld [vmem:[%s2569_s28 + $0x40] sm:$0xff]  ;;  %v2702_v36 = vld [vmem:[%s2569_s28 + $0x50] sm:$0xff]  ;;  %v2705_v37 = vld [vmem:[%s2569_s28 + $0x58] sm:$0xff] }
  0x8f   : > { %1767 = vmatpush3.bf16.msra.mxu0 %v2007_v3  ;;  %1920 = vmatpush3.bf16.msra.mxu1 %v2007_v3  ;;  %v357_v45 = vadd.f32 %v356_v38, %v355_v29  ;;  %v482_v46 = vrot.slane %v481_v39, 2  ;;  %v476_v48 = vadd.f32 %v475_v41, %v474_v34  ;;  %v376_v1 = vadd.f32 %v375_v50, %v374_v31  ;;  %v2689_v29 = vld [vmem:[%s2569_s28 + $0x48] sm:$0xff] }
  0x90   : > { %1768 = vmatprep.subr.bf16.mxu0 %v2348_v0  ;;  %1913 = vmatprep.subr.bf16.mxu1 %v2348_v0  ;;  %v364_v49 = vadd.f32 %v363_v42, %v362_v35  ;;  %v370_v53 = vrot.slane %v369_v43, 2  ;;  %v489_v57 = vrot.slane %v488_v44, 2  ;;  %v495_v2 = vadd.f32 %v494_v54, %v493_v40 }
  0x91   : > { %v358_v51 = vrot.slane %v357_v45, 1  ;;  %v483_v52 = vadd.f32 %v482_v46, %v481_v39  ;;  %v477_v55 = vrot.slane %v476_v48, 1  ;;  %v381_v38 = vadd.f32 %v2689_v29, %v2686_v25 }
  0x92   : > { %v365_v56 = vrot.slane %v364_v49, 1  ;;  %v371_v63 = vadd.f32 %v370_v53, %v369_v43  ;;  %v490_v8 = vadd.f32 %v489_v57, %v488_v44  ;;  %v496_v24 = vrot.slane %v495_v2, 2 }
  0x93   : > { %1769 = vmatpush3.bf16.msra.mxu0 %v2008_v4  ;;  %1921 = vmatpush3.bf16.msra.mxu1 %v2008_v4  ;;  %v359_v58 = vadd.f32 %v358_v51, %v357_v45  ;;  %v484_v59 = vrot.slane %v483_v52, 1  ;;  %v478_v61 = vadd.f32 %v477_v55, %v476_v48  ;;  %v382_v45 = vrot.slane %v381_v38, 4 }
  0x94   : > { %1770 = vmatprep.subr.bf16.mxu0 %v2348_v0  ;;  %1914 = vmatprep.subr.bf16.mxu1 %v2348_v0  ;;  %v366_v4 = vadd.f32 %v365_v56, %v364_v49  ;;  %v491_v31 = vrot.slane %v490_v8, 1  ;;  %v497_v41 = vadd.f32 %v496_v24, %v495_v2  ;;  %v388_v46 = vadd.f32 %v2705_v37, %v2702_v36  ;;  %v2754_v24 = vld [vmem:[%s2569_s28 + $0x70] sm:$0xff] }
  0x95   : > { %v2671_v62 = vmul.f32 0.0625, %v359_v58  ;;  %v2673_v3 = vmul.f32 0.0625, %v478_v61  ;;  %v485_v17 = vadd.f32 %v484_v59, %v483_v52  ;;  %v2730_v58 = vld [vmem:[%s2569_s28 + $0x60] sm:$0xff]  ;;  %v2733_v59 = vld [vmem:[%s2569_s28 + $0x68] sm:$0xff] }
  0x96   : > { %v2691_v30 = vmul.f32 0.0625, %v366_v4  ;;  %v492_v44 = vadd.f32 %v491_v31, %v490_v8  ;;  %v389_v54 = vrot.slane %v388_v46, 4  ;;  %v395_v8 = vadd.f32 %v2733_v59, %v2730_v58 }
  0x97   : > { %1771 = vmatpush3.bf16.msra.mxu0 %v2009_v33  ;;  %1922 = vmatpush3.bf16.msra.mxu1 %v2009_v33  ;;  %v530_v12 = vsub.f32 %v2600_v5, %v2671_v62  ;;  %v531_v13 = vsub.f32 %v2603_v6, %v2671_v62  ;;  %v564_v22 = vsub.f32 %v2606_v7, %v2673_v3  ;;  %v372_v5 = vrot.slane %v371_v63, 1  ;;  %v2694_v7 = vld [vmem:[%s2569_s28 + $0x150] sm:$0xff]  ;;  %v2697_v33 = vld [vmem:[%s2569_s28 + $0x158] sm:$0xff] }
  0x98   : > { %1772 = vmatprep.subr.bf16.mxu0 %v2348_v0  ;;  %1915 = vmatprep.subr.bf16.mxu1 %v2348_v0  ;;  %v565_v23 = vsub.f32 %v2611_v9, %v2673_v3  ;;  %v377_v6 = vrot.slane %v376_v1, 2  ;;  %v2699_v35 = vmul.f32 0.0625, %v485_v17  ;;  %v500_v42 = vadd.f32 %v2697_v33, %v2694_v7 }
  0x99   : > { %v574_v9 = vpack.c.bf16 %v531_v13, %v530_v12  ;;  %v373_v39 = vadd.f32 %v372_v5, %v371_v63  ;;  %v532_v43 = vsub.f32 %v2614_v10, %v2691_v30  ;;  %v383_v10 = vadd.f32 %v382_v45, %v381_v38 }
  0x9a   : > { %v591_v34 = vpack.c.bf16 %v565_v23, %v564_v22  ;;  %v378_v40 = vadd.f32 %v377_v6, %v376_v1  ;;  %v566_v48 = vsub.f32 %v2624_v14, %v2699_v35  ;;  %v567_v49 = vsub.f32 %v2627_v15, %v2699_v35 }
  0x9b   : > { %1773 = vmatpush3.bf16.msra.mxu0 %v2010_v47  ;;  %1923 = vmatpush3.bf16.msra.mxu1 %v2010_v47  ;;  %v533_v47 = vsub.f32 %v2617_v11, %v2691_v30  ;;  %v501_v50 = vrot.slane %v500_v42, 4  ;;  %v2725_v51 = vmul.f32 0.0625, %v373_v39  ;;  %v2727_v53 = vmul.f32 0.0625, %v492_v44 }
  0x9c   : > { %1774 = vmatprep.subr.bf16.mxu0 %v2348_v0  ;;  %1916 = vmatprep.subr.bf16.mxu1 %v2348_v0  ;;  %v379_v52 = vrot.slane %v378_v40, 1  ;;  %v384_v14 = vrot.slane %v383_v10, 2  ;;  %v592_v56 = vpack.c.bf16 %v567_v49, %v566_v48  ;;  %v498_v15 = vrot.slane %v497_v41, 1 }
  0x9d   : > { %v502_v11 = vadd.f32 %v501_v50, %v500_v42  ;;  %v575_v55 = vpack.c.bf16 %v533_v47, %v532_v43  ;;  %v535_v61 = vsub.f32 %v2637_v19, %v2725_v51  ;;  %v568_v1 = vsub.f32 %v2640_v20, %v2727_v53  ;;  %v2779_v47 = vld [vmem:[%s2569_s28 + $0x88] sm:$0xff] }
  0x9e   : > { %v380_v63 = vadd.f32 %v379_v52, %v378_v40  ;;  %v385_v2 = vadd.f32 %v384_v14, %v383_v10  ;;  %v390_v4 = vadd.f32 %v389_v54, %v388_v46  ;;  %v569_v12 = vsub.f32 %v2643_v21, %v2727_v53  ;;  %v2757_v21 = vld [vmem:[%s2569_s28 + $0x78] sm:$0xff]  ;;  %v2776_v46 = vld [vmem:[%s2569_s28 + $0x80] sm:$0xff] }
  0x9f   : > { %1775 = vmatpush3.bf16.msra.mxu0 %v2011_v60  ;;  %1924 = vmatpush3.bf16.msra.mxu1 %v2011_v60  ;;  %v503_v57 = vrot.slane %v502_v11, 2  ;;  %v534_v60 = vsub.f32 %v2630_v16, %v2725_v51  ;;  %v499_v16 = vadd.f32 %v498_v15, %v497_v41  ;;  %v402_v40 = vadd.f32 %v2757_v21, %v2754_v24 }
  0xa0   : > { %1776 = vmatprep.subr.bf16.mxu0 %v2348_v0  ;;  %1917 = vmatprep.subr.bf16.mxu1 %v2348_v0  ;;  %v2749_v19 = vmul.f32 0.0625, %v380_v63  ;;  %v386_v20 = vrot.slane %v385_v2, 1  ;;  %v391_v17 = vrot.slane %v390_v4, 2  ;;  %v593_v23 = vpack.c.bf16 %v569_v12, %v568_v1  ;;  %v349_v1 = vld [vmem:[%s2579_s12 + $0x90] sm:$0xff]  ;;  %v351_v12 = vld [vmem:[%s2579_s12 + $0xa0] sm:$0xff] }
  0xa1   : > { %v504_v13 = vadd.f32 %v503_v57, %v502_v11  ;;  %v576_v22 = vpack.c.bf16 %v535_v61, %v534_v60  ;;  %v2751_v5 = vmul.f32 0.0625, %v499_v16  ;;  %v403_v45 = vrot.slane %v402_v40, 4  ;;  %v2795_v57 = vld [vmem:[%s2569_s28 + $0x90] sm:$0xff]  ;;  %v2798_v60 = vld [vmem:[%s2569_s28 + $0x98] sm:$0xff] }
  0xa2   : > { %v536_v31 = vsub.f32 %v2650_v26, %v2749_v19  ;;  %v392_v38 = vadd.f32 %v391_v17, %v390_v4  ;;  %v409_v49 = vadd.f32 %v2779_v47, %v2776_v46  ;;  %v416_v4 = vadd.f32 %v2798_v60, %v2795_v57 }
  0xa3   : > { %1777 = vmatpush3.bf16.msra.mxu0 %v2012_v18  ;;  %1925 = vmatpush3.bf16.msra.mxu1 %v2012_v18  ;;  %v396_v18 = vrot.slane %v395_v8, 4  ;;  %v505_v6 = vrot.slane %v504_v13, 1  ;;  %v570_v41 = vsub.f32 %v2656_v28, %v2751_v5  ;;  %v571_v42 = vsub.f32 %v2661_v32, %v2751_v5 }
  0xa4   : > { %v393_v43 = vrot.slane %v392_v38, 1  ;;  %v404_v11 = vadd.f32 %v403_v45, %v402_v40  ;;  %v410_v63 = vrot.slane %v409_v49, 4  ;;  %v636_v17 = vsub.f32 %v349_v1, %v2699_v35 }
  0xa5   : > { %v397_v39 = vadd.f32 %v396_v18, %v395_v8  ;;  %v506_v26 = vadd.f32 %v505_v6, %v504_v13  ;;  %v594_v48 = vpack.c.bf16 %v571_v42, %v570_v41  ;;  %v350_v8 = vld [vmem:[%s2579_s12 + $0x98] sm:$0xff]  ;;  %v638_v35 = vsub.f32 %v351_v12, %v2751_v5  ;;  %v333_v41 = vld [vmem:[%s2579_s12 + $0x10] sm:$0xff] }
  0xa6   : > { %1779 = vmatmul.mubr.bf16.vlgmr.msra.gmra.mrb[0].mxu0 %v574_v9  ;;  %1847 = vmatmul.mubr.bf16.vlgmr.msra.gmra.mrb[0].mxu1 %v591_v34  ;;  %v537_v9 = vsub.f32 %v2653_v27, %v2749_v19  ;;  %v387_v34 = vadd.f32 %v386_v20, %v385_v2  ;;  %v394_v10 = vadd.f32 %v393_v43, %v392_v38  ;;  %v405_v15 = vrot.slane %v404_v11, 2  ;;  %v334_v42 = vld [vmem:[%s2579_s12 + $0x18] sm:$0xff]  ;;  %v2835_v43 = vld [vmem:[%s2569_s28 + $0xb0] sm:$0xff] }
  0xa7   : > { %1782 = vmatprep.mubr.msk.bf16.mxu0 %vm2349_vm0, %v2348_v0  ;;  %1850 = vmatprep.mubr.msk.bf16.mxu1 %vm2349_vm0, %v2348_v0  ;;  %v398_v44 = vrot.slane %v397_v39, 2  ;;  %v529_v32 = vmul.f32 0.0625, %v506_v26 }
  0xa8   : > { %v2773_v27 = vmul.f32 0.0625, %v387_v34  ;;  %v577_v28 = vpack.c.bf16 %v537_v9, %v536_v31  ;;  %v406_v20 = vadd.f32 %v405_v15, %v404_v11  ;;  %v2825_v31 = vld [vmem:[%s2569_s28 + $0xa0] sm:$0xff]  ;;  %v2828_v9 = vld [vmem:[%s2569_s28 + $0xa8] sm:$0xff] }
  0xa9   : > { %v399_v52 = vadd.f32 %v398_v44, %v397_v39  ;;  %v572_v54 = vsub.f32 %v2694_v7, %v529_v32  ;;  %v2800_v7 = vmul.f32 0.0625, %v394_v10  ;;  %v423_v45 = vadd.f32 %v2828_v9, %v2825_v31  ;;  %v335_v11 = vld [vmem:[%s2579_s12 + $0x20] sm:$0xff]  ;;  %v2862_v15 = vld [vmem:[%s2569_s28 + $0xc8] sm:$0xff] }
  0xaa   : > { %v538_v50 = vsub.f32 %v2686_v25, %v2773_v27  ;;  %v539_v14 = vsub.f32 %v2689_v29, %v2773_v27  ;;  %v331_v25 = vld [vmem:[%s2579_s12] sm:$0xff] }
  0xab   : > { %v618_v2 = vsub.f32 %v331_v25, %v2671_v62  ;;  %v540_v18 = vsub.f32 %v2702_v36, %v2800_v7  ;;  %v541_v62 = vsub.f32 %v2705_v37, %v2800_v7  ;;  %v417_v36 = vrot.slane %v416_v4, 4 }
  0xac   : > { %v578_v29 = vpack.c.bf16 %v539_v14, %v538_v50  ;;  %v407_v37 = vrot.slane %v406_v20, 1  ;;  %v336_v14 = vld [vmem:[%s2579_s12 + $0x28] sm:$0xff] }
  0xad   : > { %v579_v39 = vpack.c.bf16 %v541_v62, %v540_v18  ;;  %v418_v44 = vadd.f32 %v417_v36, %v416_v4  ;;  %v623_v4 = vsub.f32 %v336_v14, %v2800_v7  ;;  %v2884_v62 = vld [vmem:[%s2569_s28 + $0xe0] sm:$0xff] }
  0xae   : > { %1783 = vmatmul.mubr.bf16.gmra.mrb[4].mxu0 %v575_v55  ;;  %1851 = vmatmul.mubr.bf16.gmra.mrb[4].mxu1 %v592_v56  ;;  %v573_v55 = vsub.f32 %v2697_v33, %v529_v32  ;;  %v400_v56 = vrot.slane %v399_v52, 1  ;;  %v332_v33 = vld [vmem:[%s2579_s12 + $0x8] sm:$0xff] }
  0xaf   : > { %1786 = vmatprep.mubr.msk.bf16.mxu0 %vm2349_vm0, %v2348_v0  ;;  %1854 = vmatprep.mubr.msk.bf16.mxu1 %vm2349_vm0, %v2348_v0  ;;  %v619_v16 = vsub.f32 %v332_v33, %v2691_v30  ;;  %v637_v30 = vsub.f32 %v350_v8, %v2727_v53  ;;  %v2838_v53 = vld [vmem:[%s2569_s28 + $0xb8] sm:$0xff]  ;;  %v622_v33 = vsub.f32 %v335_v11, %v2773_v27 }
  0xb0   : > { %v595_v61 = vpack.c.bf16 %v573_v55, %v572_v54  ;;  %v401_v13 = vadd.f32 %v400_v56, %v399_v52  ;;  %v430_v52 = vadd.f32 %v2838_v53, %v2835_v43  ;;  %v2859_v54 = vld [vmem:[%s2569_s28 + $0xc0] sm:$0xff]  ;;  %v340_v11 = vld [vmem:[%s2579_s12 + $0x48] sm:$0xff] }
  0xb1   : > { %v2830_v34 = vpack.c.bf16 %v637_v30, %v636_v17  ;;  %v640_v40 = vpack.c.bf16 %v619_v16, %v618_v2  ;;  %v437_v8 = vadd.f32 %v2862_v15, %v2859_v54 }
  0xb2   : > { %v2822_v6 = vmul.f32 0.0625, %v401_v13  ;;  %v431_v56 = vrot.slane %v430_v52, 4 }
  0xb3   : > { %v438_v17 = vrot.slane %v437_v8, 4 }
  0xb4   : > { %v543_v50 = vsub.f32 %v2733_v59, %v2822_v6  ;;  %v432_v13 = vadd.f32 %v431_v56, %v430_v52  ;;  %v339_v52 = vld [vmem:[%s2579_s12 + $0x40] sm:$0xff] }
  0xb6   : > { %1787 = vmatmul.mubr.bf16.gmra.mrb[8].mxu0 %v576_v22  ;;  %1855 = vmatmul.mubr.bf16.gmra.mrb[8].mxu1 %v593_v23  ;;  %v411_v22 = vadd.f32 %v410_v63, %v409_v49  ;;  %v352_v23 = vld [vmem:[%s2579_s12 + $0xa8] sm:$0xff]  ;;  %v408_v49 = vadd.f32 %v407_v37, %v406_v20  ;;  %v337_v20 = vld [vmem:[%s2579_s12 + $0x30] sm:$0xff]  ;;  %v433_v36 = vrot.slane %v432_v13, 2 }
  0xb7   : > { %1790 = vmatprep.mubr.msk.bf16.mxu0 %vm2349_vm0, %v2348_v0  ;;  %1858 = vmatprep.mubr.msk.bf16.mxu1 %vm2349_vm0, %v2348_v0  ;;  %v639_v38 = vsub.f32 %v352_v23, %v529_v32  ;;  %v621_v32 = vsub.f32 %v334_v42, %v2749_v19  ;;  %v642_v23 = vpack.c.bf16 %v623_v4, %v622_v33  ;;  %v2891_v37 = vld [vmem:[%s2569_s28 + $0xf0] sm:$0xff] }
  0xb8   : > { %v412_v26 = vrot.slane %v411_v22, 2  ;;  %v515_v19 = vmul.f32 0.0625, %v408_v49 }
  0xb9   : > { %v2840_v5 = vpack.c.bf16 %v639_v38, %v638_v35  ;;  %v338_v35 = vld [vmem:[%s2579_s12 + $0x38] sm:$0xff] }
  0xba   : > { %v413_v10 = vadd.f32 %v412_v26, %v411_v22  ;;  %v544_v2 = vsub.f32 %v2754_v24, %v515_v19  ;;  %v545_v27 = vsub.f32 %v2757_v21, %v515_v19  ;;  %v2887_v22 = vld [vmem:[%s2569_s28 + $0xe8] sm:$0xff]  ;;  %v2894_v38 = vld [vmem:[%s2569_s28 + $0xf8] sm:$0xff]  ;;  %v625_v26 = vsub.f32 %v338_v35, %v515_v19 }
  0xbb   : > { %v451_v42 = vadd.f32 %v2887_v22, %v2884_v62 }
  0xbc   : > { %v414_v25 = vrot.slane %v413_v10, 1  ;;  %v581_v21 = vpack.c.bf16 %v545_v27, %v544_v2 }
  0xbe   : > { %1791 = vmatmul.mubr.bf16.gmra.mrb[12].mxu0 %v577_v28  ;;  %1859 = vmatmul.mubr.bf16.gmra.mrb[12].mxu1 %v594_v48  ;;  %v542_v28 = vsub.f32 %v2730_v58, %v2822_v6  ;;  %v620_v48 = vsub.f32 %v333_v41, %v2725_v51  ;;  %v419_v51 = vrot.slane %v418_v44, 2  ;;  %v424_v58 = vrot.slane %v423_v45, 4 }
  0xbf   : > { %1794 = vmatprep.mubr.msk.bf16.mxu0 %vm2349_vm0, %v2348_v0  ;;  %1862 = vmatprep.mubr.msk.bf16.mxu1 %vm2349_vm0, %v2348_v0  ;;  %v415_v16 = vadd.f32 %v414_v25, %v413_v10 }
  0xc0   : > { %v580_v59 = vpack.c.bf16 %v543_v50, %v542_v28  ;;  %v641_v55 = vpack.c.bf16 %v621_v32, %v620_v48  ;;  %v420_v63 = vadd.f32 %v419_v51, %v418_v44  ;;  %v425_v1 = vadd.f32 %v424_v58, %v423_v45 }
  0xc1   : > { %v516_v30 = vmul.f32 0.0625, %v415_v16  ;;  %v439_v44 = vadd.f32 %v438_v17, %v437_v8  ;;  %v458_v28 = vadd.f32 %v2894_v38, %v2891_v37  ;;  %v434_v32 = vadd.f32 %v433_v36, %v432_v13  ;;  %v341_v17 = vld [vmem:[%s2579_s12 + $0x50] sm:$0xff] }
  0xc2   : > { %v421_v24 = vrot.slane %v420_v63, 1  ;;  %v426_v7 = vrot.slane %v425_v1, 2  ;;  %v452_v58 = vrot.slane %v451_v42, 4 }
  0xc3   : > { %v546_v48 = vsub.f32 %v2776_v46, %v516_v30  ;;  %v440_v51 = vrot.slane %v439_v44, 2  ;;  %v435_v46 = vrot.slane %v434_v32, 1  ;;  %v626_v33 = vsub.f32 %v339_v52, %v516_v30 }
  0xc4   : > { %v427_v41 = vadd.f32 %v426_v7, %v425_v1  ;;  %v453_v4 = vadd.f32 %v452_v58, %v451_v42 }
  0xc5   : > { %v441_v2 = vadd.f32 %v440_v51, %v439_v44 }
  0xc6   : > { %1795 = vmatmul.mubr.bf16.gmra.mrb[16].mxu0 %v578_v29  ;;  %1863 = vmatmul.mubr.bf16.gmra.mrb[16].mxu1 %v595_v61  ;;  %v2865_v29 = vld [vmem:[%s2569_s28 + $0xd0] sm:$0xff]  ;;  %v2868_v61 = vld [vmem:[%s2569_s28 + $0xd8] sm:$0xff]  ;;  %v428_v50 = vrot.slane %v427_v41, 1 }
  0xc7   : > { %1798 = vmatprep.mubr.msk.bf16.mxu0 %vm2349_vm0, %v2348_v0  ;;  %1866 = vmatprep.mubr.msk.bf16.mxu1 %vm2349_vm0, %v2348_v0  ;;  %v444_v12 = vadd.f32 %v2868_v61, %v2865_v29  ;;  %v442_v13 = vrot.slane %v441_v2, 1 }
  0xc9   : > { %v445_v18 = vrot.slane %v444_v12, 4 }
  0xcb   : > { %v446_v45 = vadd.f32 %v445_v18, %v444_v12  ;;  %v436_v12 = vadd.f32 %v435_v46, %v434_v32 }
  0xcd   : > { %v447_v14 = vrot.slane %v446_v45, 2  ;;  %v519_v18 = vmul.f32 0.0625, %v436_v12 }
  0xce   : > { %1799 = vmatmul.mubr.bf16.gmra.mrb[20].mxu0 %v579_v39  ;;  %1867 = vmatmul.mubr.bf16.gmra.mrb[20].mxu1 %v640_v40  ;;  %v624_v39 = vsub.f32 %v337_v20, %v2822_v6  ;;  %v422_v40 = vadd.f32 %v421_v24, %v420_v63  ;;  %v547_v6 = vsub.f32 %v2779_v47, %v516_v30  ;;  %v2910_v47 = vld [vmem:[%s2569_s28 + $0x100] sm:$0xff]  ;;  %v454_v24 = vrot.slane %v453_v4, 2  ;;  %v342_v30 = vld [vmem:[%s2579_s12 + $0x58] sm:$0xff] }
  0xcf   : > { %1802 = vmatprep.mubr.msk.bf16.mxu0 %vm2349_vm0, %v2348_v0  ;;  %1870 = vmatprep.mubr.msk.bf16.mxu1 %vm2349_vm0, %v2348_v0  ;;  %v429_v63 = vadd.f32 %v428_v50, %v427_v41  ;;  %v448_v27 = vadd.f32 %v447_v14, %v446_v45  ;;  %v552_v52 = vsub.f32 %v2835_v43, %v519_v18 }
  0xd0   : > { %v517_v49 = vmul.f32 0.0625, %v422_v40  ;;  %v643_v10 = vpack.c.bf16 %v625_v26, %v624_v39  ;;  %v582_v19 = vpack.c.bf16 %v547_v6, %v546_v48  ;;  %v443_v40 = vadd.f32 %v442_v13, %v441_v2  ;;  %v343_v6 = vld [vmem:[%s2579_s12 + $0x60] sm:$0xff] }
  0xd1   : > { %v455_v41 = vadd.f32 %v454_v24, %v453_v4  ;;  %v629_v26 = vsub.f32 %v342_v30, %v519_v18  ;;  %v553_v51 = vsub.f32 %v2838_v53, %v519_v18  ;;  %v347_v13 = vld [vmem:[%s2579_s12 + $0x80] sm:$0xff] }
  0xd2   : > { %v548_v25 = vsub.f32 %v2795_v57, %v517_v49  ;;  %v549_v56 = vsub.f32 %v2798_v60, %v517_v49  ;;  %v627_v1 = vsub.f32 %v340_v11, %v517_v49  ;;  %v518_v57 = vmul.f32 0.0625, %v429_v63  ;;  %v346_v63 = vld [vmem:[%s2579_s12 + $0x78] sm:$0xff] }
  0xd4   : > { %v583_v60 = vpack.c.bf16 %v549_v56, %v548_v25  ;;  %v644_v20 = vpack.c.bf16 %v627_v1, %v626_v33  ;;  %v550_v35 = vsub.f32 %v2825_v31, %v518_v57  ;;  %v551_v36 = vsub.f32 %v2828_v9, %v518_v57  ;;  %v345_v33 = vld [vmem:[%s2579_s12 + $0x70] sm:$0xff] }
  0xd5   : > { %v628_v39 = vsub.f32 %v341_v17, %v518_v57  ;;  %v456_v9 = vrot.slane %v455_v41, 1  ;;  %v348_v57 = vld [vmem:[%s2579_s12 + $0x88] sm:$0xff] }
  0xd6   : > { %1803 = vmatmul.mubr.bf16.gmra.mrb[24].mxu0 %v580_v59  ;;  %1871 = vmatmul.mubr.bf16.gmra.mrb[24].mxu1 %v641_v55  ;;  %v459_v59 = vrot.slane %v458_v28, 4  ;;  %v2913_v55 = vld [vmem:[%s2569_s28 + $0x108] sm:$0xff]  ;;  %v584_v31 = vpack.c.bf16 %v551_v36, %v550_v35  ;;  %s2239_s28 = scalar_lea.vmem %s2238_s5, 11264 }
  0xd7   : > { %1806 = vmatprep.mubr.msk.bf16.mxu0 %vm2349_vm0, %v2348_v0  ;;  %1874 = vmatprep.mubr.msk.bf16.mxu1 %vm2349_vm0, %v2348_v0  ;;  %v465_v8 = vadd.f32 %v2913_v55, %v2910_v47  ;;  %v645_v48 = vpack.c.bf16 %v629_v26, %v628_v39  ;;  %p2241_p5 = scmp.lt.s32.totalorder %s2239_s28, %s2233_s6 }
  0xd8   : > { %v460_v16 = vadd.f32 %v459_v59, %v458_v28  ;;  %v520_v28 = vmul.f32 0.0625, %v443_v40  ;;  %v585_v59 = vpack.c.bf16 %v553_v51, %v552_v52 }
  0xd9   : > { %v466_v7 = vrot.slane %v465_v8, 4  ;;  %p2242_p1 = por %p2241_p5, %p2240_p2 }
  0xda   : > { %v630_v58 = vsub.f32 %v343_v6, %v520_v28  ;;  %v554_v1 = vsub.f32 %v2859_v54, %v520_v28  ;;  %v555_v2 = vsub.f32 %v2862_v15, %v520_v28  ;;  %v635_v54 = vsub.f32 %v348_v57, %v2673_v3 }
  0xdb   : > { %v467_v42 = vadd.f32 %v466_v7, %v465_v8  ;;  %p2243_p6 = pnand %p2242_p1, %p2236_p9 }
  0xdd   : > { %v468_v50 = vrot.slane %v467_v42, 2 }
  0xde   : > { %1807 = vmatmul.mubr.bf16.gmra.mrb[28].mxu0 %v581_v21  ;;  %1875 = vmatmul.mubr.bf16.gmra.mrb[28].mxu1 %v642_v23  ;;  %v449_v21 = vrot.slane %v448_v27, 1  ;;  %v461_v23 = vrot.slane %v460_v16, 2 }
  0xdf   : > { %1810 = vmatprep.mubr.msk.bf16.mxu0 %vm2349_vm0, %v2348_v0  ;;  %1878 = vmatprep.mubr.msk.bf16.mxu1 %vm2349_vm0, %v2348_v0  ;;  %v469_v14 = vadd.f32 %v468_v50, %v467_v42 }
  0xe0   : > { %v450_v44 = vadd.f32 %v449_v21, %v448_v27  ;;  %v462_v45 = vadd.f32 %v461_v23, %v460_v16  ;;  %v586_v27 = vpack.c.bf16 %v555_v2, %v554_v1 }
  0xe1   : > { %v470_v53 = vrot.slane %v469_v14, 1 }
  0xe2   : > { %v521_v32 = vmul.f32 0.0625, %v450_v44  ;;  %v463_v49 = vrot.slane %v462_v45, 1 }
  0xe3   : > { %v471_v12 = vadd.f32 %v470_v53, %v469_v14 }
  0xe4   : > { %v464_v46 = vadd.f32 %v463_v49, %v462_v45  ;;  %v556_v15 = vsub.f32 %v2865_v29, %v521_v32  ;;  %v557_v24 = vsub.f32 %v2868_v61, %v521_v32 }
  0xe6   : > { %1811 = vmatmul.mubr.bf16.gmra.mrb[32].mxu0 %v582_v19  ;;  %1879 = vmatmul.mubr.bf16.gmra.mrb[32].mxu1 %v643_v10  ;;  %v344_v10 = vld [vmem:[%s2579_s12 + $0x68] sm:$0xff]  ;;  %v457_v19 = vadd.f32 %v456_v9, %v455_v41  ;;  %v523_v56 = vmul.f32 0.0625, %v464_v46 }
  0xe7   : > { %1814 = vmatprep.mubr.msk.bf16.mxu0 %vm2349_vm0, %v2348_v0  ;;  %1882 = vmatprep.mubr.msk.bf16.mxu1 %vm2349_vm0, %v2348_v0  ;;  %v631_v11 = vsub.f32 %v344_v10, %v521_v32 }
  0xe8   : > { %v522_v43 = vmul.f32 0.0625, %v457_v19  ;;  %v633_v8 = vsub.f32 %v346_v63, %v523_v56  ;;  %v560_v61 = vsub.f32 %v2891_v37, %v523_v56  ;;  %v561_v21 = vsub.f32 %v2894_v38, %v523_v56 }
  0xe9   : > { %v646_v25 = vpack.c.bf16 %v631_v11, %v630_v58 }
  0xea   : > { %v632_v4 = vsub.f32 %v345_v33, %v522_v43  ;;  %v558_v18 = vsub.f32 %v2884_v62, %v522_v43  ;;  %v559_v3 = vsub.f32 %v2887_v22, %v522_v43  ;;  %v589_v62 = vpack.c.bf16 %v561_v21, %v560_v61 }
  0xec   : > { %v647_v16 = vpack.c.bf16 %v633_v8, %v632_v4  ;;  %v588_v29 = vpack.c.bf16 %v559_v3, %v558_v18 }
  0xee   : > { %1815 = vmatmul.mubr.bf16.gmra.mrb[36].mxu0 %v583_v60  ;;  %1883 = vmatmul.mubr.bf16.gmra.mrb[36].mxu1 %v644_v20  ;;  %v524_v60 = vmul.f32 0.0625, %v471_v12  ;;  %v587_v20 = vpack.c.bf16 %v557_v24, %v556_v15 }
  0xef   : > { %1818 = vmatprep.mubr.msk.bf16.mxu0 %vm2349_vm0, %v2348_v0  ;;  %1886 = vmatprep.mubr.msk.bf16.mxu1 %vm2349_vm0, %v2348_v0 }
  0xf0   : > { %v634_v7 = vsub.f32 %v347_v13, %v524_v60  ;;  %v562_v22 = vsub.f32 %v2910_v47, %v524_v60  ;;  %v563_v23 = vsub.f32 %v2913_v55, %v524_v60 }
  0xf2   : > { %v648_v17 = vpack.c.bf16 %v635_v54, %v634_v7 }
  0xf6   : > { %1819 = vmatmul.mubr.bf16.gmra.mrb[40].mxu0 %v584_v31  ;;  %1887 = vmatmul.mubr.bf16.gmra.mrb[40].mxu1 %v645_v48 }
  0xf7   : > { %1822 = vmatprep.mubr.msk.bf16.mxu0 %vm2349_vm0, %v2348_v0  ;;  %1890 = vmatprep.mubr.msk.bf16.mxu1 %vm2349_vm0, %v2348_v0 }
  0xfe   : > { %1823 = vmatmul.mubr.bf16.gmra.mrb[44].mxu0 %v585_v59  ;;  %1891 = vmatmul.mubr.bf16.gmra.mrb[44].mxu1 %v646_v25 }
  0xff   : > { %1826 = vmatprep.mubr.msk.bf16.mxu0 %vm2349_vm0, %v2348_v0  ;;  %1894 = vmatprep.mubr.msk.bf16.mxu1 %vm2349_vm0, %v2348_v0 }
 0x106   : > { %1827 = vmatmul.mubr.bf16.gmra.mrb[48].mxu0 %v586_v27  ;;  %1895 = vmatmul.mubr.bf16.gmra.mrb[48].mxu1 %v647_v16 }
 0x107   : > { %1830 = vmatprep.mubr.msk.bf16.mxu0 %vm2349_vm0, %v2348_v0  ;;  %1898 = vmatprep.mubr.msk.bf16.mxu1 %vm2349_vm0, %v2348_v0 }
 0x10e   : > { %1831 = vmatmul.mubr.bf16.gmra.mrb[52].mxu0 %v587_v20  ;;  %1899 = vmatmul.mubr.bf16.gmra.mrb[52].mxu1 %v648_v17 }
 0x10f   : > { %1834 = vmatprep.mubr.msk.bf16.mxu0 %vm2349_vm0, %v2348_v0  ;;  %1902 = vmatprep.mubr.msk.bf16.mxu1 %vm2349_vm0, %v2348_v0 }
 0x116   : > { %1835 = vmatmul.mubr.bf16.gmra.mrb[56].mxu0 %v588_v29  ;;  %1903 = vmatmul.mubr.bf16.gmra.mrb[56].mxu1 %v2830_v34  ;;  %v590_v34 = vpack.c.bf16 %v563_v23, %v562_v22 }
 0x117   : > { %1838 = vmatprep.mubr.msk.bf16.mxu0 %vm2349_vm0, %v2348_v0  ;;  %1906 = vmatprep.mubr.msk.bf16.mxu1 %vm2349_vm0, %v2348_v0 }
 0x11e   : > { %1839 = vmatmul.mubr.bf16.gmra.mrb[60].mxu0 %v589_v62  ;;  %1907 = vmatmul.mubr.bf16.gmra.mrb[60].mxu1 %v2840_v5 }
 0x11f   : > { %1842 = vmatprep.mubr.msk.bf16.mxu0 %vm2349_vm0, %v2348_v0 }
 0x126   : > { %1843 = vmatmul.mubr.bf16.gmra.mrb[64].mxu0 %v590_v34 }
 0x179   : > { %v2974_v37 = vpop.f32.mrb[0].mxu0  ;;  %v2976_v38 = vpop.f32.mrb[0].mxu1 }
 0x17a   : > { %v1780_v30 = vpop.f32.mrb[1].mxu0  ;;  %v1848_v35 = vpop.f32.mrb[1].mxu1  ;;  %v1056_v36 = vmul.f32 %v2974_v37, %v2974_v37  ;;  %v1090_v40 = vmul.f32 %v2976_v38, %v2976_v38 }
 0x17b   : > { %v2980_v39 = vpop.f32.mrb[2].mxu0  ;;  %v2982_v47 = vpop.f32.mrb[2].mxu1 }
 0x17c   : > { %1122 = vadd.xlane.f32.xlu0 %v1056_v36  ;;  %v1781_v5 = vpop.f32.mrb[3].mxu0  ;;  %v1849_v55 = vpop.f32.mrb[3].mxu1  ;;  %v1091_v0 = vmul.f32 %v2982_v47, %v2982_v47  ;;  %v1057_v44 = vmul.f32 %v2980_v39, %v2980_v39 }
 0x17e   : > { %1192 = vadd.xlane.f32.xlu1 %v1091_v0 }
 0x180   : > { %1190 = vadd.xlane.f32.xlu0 %v1090_v40 }
 0x181   : > { %v2988_v41 = vpop.f32.mrb[4].mxu0  ;;  %v2990_v42 = vpop.f32.mrb[4].mxu1 }
 0x182   : > { %v1784_v26 = vpop.f32.mrb[5].mxu0  ;;  %v1058_v45 = vmul.f32 %v2988_v41, %v2988_v41  ;;  %v1852_v31 = vpop.f32.mrb[5].mxu1  ;;  %v1092_v6 = vmul.f32 %v2990_v42, %v2990_v42 }
 0x183   : > { %v2996_v28 = vpop.f32.mrb[6].mxu0  ;;  %v2998_v9 = vpop.f32.mrb[6].mxu1 }
 0x184   : > { %1124 = vadd.xlane.f32.xlu0 %v1057_v44  ;;  %1126 = vadd.xlane.f32.xlu1 %v1058_v45  ;;  %v1785_v48 = vpop.f32.mrb[7].mxu0  ;;  %v1853_v32 = vpop.f32.mrb[7].mxu1  ;;  %v1059_v49 = vmul.f32 %v2996_v28, %v2996_v28  ;;  %v1093_v50 = vmul.f32 %v2998_v9, %v2998_v9 }
 0x188   : > { %1194 = vadd.xlane.f32.xlu0 %v1092_v6  ;;  %1128 = vadd.xlane.f32.xlu1 %v1059_v49 }
 0x189   : > { %v3006_v10 = vpop.f32.mrb[8].mxu0  ;;  %v3008_v52 = vpop.f32.mrb[8].mxu1 }
 0x18a   : > { %v1788_v51 = vpop.f32.mrb[9].mxu0  ;;  %v1060_v58 = vmul.f32 %v3006_v10, %v3006_v10  ;;  %v1856_v19 = vpop.f32.mrb[9].mxu1  ;;  %v1094_v59 = vmul.f32 %v3008_v52, %v3008_v52 }
 0x18b   : > { %v3012_v11 = vpop.f32.mrb[10].mxu0  ;;  %v3014_v46 = vpop.f32.mrb[10].mxu1 }
 0x18c   : > { %1196 = vadd.xlane.f32.xlu1 %v1093_v50  ;;  %1130 = vadd.xlane.f32.xlu0 %v1060_v58  ;;  %v1789_v14 = vpop.f32.mrb[11].mxu0  ;;  %v1857_v25 = vpop.f32.mrb[11].mxu1  ;;  %v1061_v43 = vmul.f32 %v3012_v11, %v3012_v11  ;;  %v1095_v56 = vmul.f32 %v3014_v46, %v3014_v46 }
 0x190   : > { %1198 = vadd.xlane.f32.xlu0 %v1094_v59  ;;  %1132 = vadd.xlane.f32.xlu1 %v1061_v43 }
 0x191   : > { %v3022_v53 = vpop.f32.mrb[12].mxu0  ;;  %v3024_v33 = vpop.f32.mrb[12].mxu1 }
 0x192   : > { %v1792_v63 = vpop.f32.mrb[13].mxu0  ;;  %v1062_v1 = vmul.f32 %v3022_v53, %v3022_v53  ;;  %v1860_v2 = vpop.f32.mrb[13].mxu1  ;;  %v1096_v27 = vmul.f32 %v3024_v33, %v3024_v33 }
 0x193   : > { %v3028_v4 = vpop.f32.mrb[14].mxu0  ;;  %v3030_v8 = vpop.f32.mrb[14].mxu1 }
 0x194   : > { %1200 = vadd.xlane.f32.xlu1 %v1095_v56  ;;  %1134 = vadd.xlane.f32.xlu0 %v1062_v1  ;;  %v1793_v12 = vpop.f32.mrb[15].mxu0  ;;  %v1861_v16 = vpop.f32.mrb[15].mxu1  ;;  %v1063_v57 = vmul.f32 %v3028_v4, %v3028_v4  ;;  %v1097_v60 = vmul.f32 %v3030_v8, %v3030_v8 }
 0x198   : > { %1202 = vadd.xlane.f32.xlu0 %v1096_v27  ;;  %1136 = vadd.xlane.f32.xlu1 %v1063_v57 }
 0x199   : > { %v3038_v13 = vpop.f32.mrb[16].mxu0  ;;  %v3040_v54 = vpop.f32.mrb[16].mxu1 }
 0x19a   : > { %v1796_v15 = vpop.f32.mrb[17].mxu0  ;;  %v1064_v24 = vmul.f32 %v3038_v13, %v3038_v13  ;;  %v1864_v7 = vpop.f32.mrb[17].mxu1  ;;  %v1098_v3 = vmul.f32 %v3040_v54, %v3040_v54 }
 0x19b   : > { %v3044_v20 = vpop.f32.mrb[18].mxu0  ;;  %v3046_v17 = vpop.f32.mrb[18].mxu1 }
 0x19c   : > { %1204 = vadd.xlane.f32.xlu1 %v1097_v60  ;;  %1138 = vadd.xlane.f32.xlu0 %v1064_v24  ;;  %v1797_v18 = vpop.f32.mrb[19].mxu0  ;;  %v1865_v29 = vpop.f32.mrb[19].mxu1  ;;  %v1065_v61 = vmul.f32 %v3044_v20, %v3044_v20  ;;  %v1099_v21 = vmul.f32 %v3046_v17, %v3046_v17 }
 0x1a0   : > { %1206 = vadd.xlane.f32.xlu0 %v1098_v3  ;;  %1140 = vadd.xlane.f32.xlu1 %v1065_v61 }
 0x1a1   : > { %v3054_v62 = vpop.f32.mrb[20].mxu0  ;;  %v3056_v22 = vpop.f32.mrb[20].mxu1 }
 0x1a2   : > { %v1800_v23 = vpop.f32.mrb[21].mxu0  ;;  %v1066_v34 = vmul.f32 %v3054_v62, %v3054_v62  ;;  %v1868_v30 = vpop.f32.mrb[21].mxu1  ;;  %v1100_v55 = vmul.f32 %v3056_v22, %v3056_v22 }
 0x1a3   : > { %v3060_v35 = vpop.f32.mrb[22].mxu0  ;;  %v3062_v36 = vpop.f32.mrb[22].mxu1 }
 0x1a4   : > { %1208 = vadd.xlane.f32.xlu1 %v1099_v21  ;;  %1142 = vadd.xlane.f32.xlu0 %v1066_v34  ;;  %v1801_v5 = vpop.f32.mrb[23].mxu0  ;;  %v1869_v0 = vpop.f32.mrb[23].mxu1  ;;  %v1067_v40 = vmul.f32 %v3060_v35, %v3060_v35  ;;  %v1101_v26 = vmul.f32 %v3062_v36, %v3062_v36 }
 0x1a8   : > { %1210 = vadd.xlane.f32.xlu0 %v1100_v55  ;;  %1144 = vadd.xlane.f32.xlu1 %v1067_v40 }
 0x1a9   : > { %v3070_v44 = vpop.f32.mrb[24].mxu0  ;;  %v3072_v45 = vpop.f32.mrb[24].mxu1 }
 0x1aa   : > { %v1804_v31 = vpop.f32.mrb[25].mxu0  ;;  %v1068_v48 = vmul.f32 %v3070_v44, %v3070_v44  ;;  %v1872_v6 = vpop.f32.mrb[25].mxu1  ;;  %v1102_v51 = vmul.f32 %v3072_v45, %v3072_v45 }
 0x1ab   : > { %v3076_v32 = vpop.f32.mrb[26].mxu0  ;;  %v3078_v49 = vpop.f32.mrb[26].mxu1 }
 0x1ac   : > { %1212 = vadd.xlane.f32.xlu1 %v1101_v26  ;;  %1146 = vadd.xlane.f32.xlu0 %v1068_v48  ;;  %v1805_v50 = vpop.f32.mrb[27].mxu0  ;;  %v1873_v58 = vpop.f32.mrb[27].mxu1  ;;  %v1069_v19 = vmul.f32 %v3076_v32, %v3076_v32  ;;  %v1103_v14 = vmul.f32 %v3078_v49, %v3078_v49 }
 0x1b0   : > { %1214 = vadd.xlane.f32.xlu0 %v1102_v51  ;;  %1148 = vadd.xlane.f32.xlu1 %v1069_v19 }
 0x1b1   : > { %v3086_v59 = vpop.f32.mrb[28].mxu0  ;;  %v3088_v25 = vpop.f32.mrb[28].mxu1 }
 0x1b2   : > { %v1808_v43 = vpop.f32.mrb[29].mxu0  ;;  %v1070_v56 = vmul.f32 %v3086_v59, %v3086_v59  ;;  %v1876_v63 = vpop.f32.mrb[29].mxu1  ;;  %v1104_v27 = vmul.f32 %v3088_v25, %v3088_v25 }
 0x1b3   : > { %v3092_v1 = vpop.f32.mrb[30].mxu0  ;;  %v3094_v2 = vpop.f32.mrb[30].mxu1 }
 0x1b4   : > { %1216 = vadd.xlane.f32.xlu1 %v1103_v14  ;;  %1150 = vadd.xlane.f32.xlu0 %v1070_v56  ;;  %v1809_v12 = vpop.f32.mrb[31].mxu0  ;;  %v1877_v16 = vpop.f32.mrb[31].mxu1  ;;  %v1071_v57 = vmul.f32 %v3092_v1, %v3092_v1  ;;  %v1105_v60 = vmul.f32 %v3094_v2, %v3094_v2 }
 0x1b8   : > { %1218 = vadd.xlane.f32.xlu0 %v1104_v27  ;;  %1152 = vadd.xlane.f32.xlu1 %v1071_v57 }
 0x1b9   : > { %v3102_v15 = vpop.f32.mrb[32].mxu0  ;;  %v3104_v24 = vpop.f32.mrb[32].mxu1 }
 0x1ba   : > { %v1812_v7 = vpop.f32.mrb[33].mxu0  ;;  %v1072_v18 = vmul.f32 %v3102_v15, %v3102_v15  ;;  %v1880_v3 = vpop.f32.mrb[33].mxu1  ;;  %v1106_v23 = vmul.f32 %v3104_v24, %v3104_v24 }
 0x1bb   : > { %v3108_v29 = vpop.f32.mrb[34].mxu0  ;;  %v3110_v61 = vpop.f32.mrb[34].mxu1 }
 0x1bc   : > { %1220 = vadd.xlane.f32.xlu1 %v1105_v60  ;;  %1154 = vadd.xlane.f32.xlu0 %v1072_v18  ;;  %v1813_v21 = vpop.f32.mrb[35].mxu0  ;;  %v1881_v34 = vpop.f32.mrb[35].mxu1  ;;  %v1073_v30 = vmul.f32 %v3108_v29, %v3108_v29  ;;  %v1107_v5 = vmul.f32 %v3110_v61, %v3110_v61 }
 0x1c0   : > { %1222 = vadd.xlane.f32.xlu0 %v1106_v23  ;;  %1156 = vadd.xlane.f32.xlu1 %v1073_v30 }
 0x1c1   : > { %v3118_v55 = vpop.f32.mrb[36].mxu0  ;;  %v3120_v0 = vpop.f32.mrb[36].mxu1 }
 0x1c2   : > { %v1816_v40 = vpop.f32.mrb[37].mxu0  ;;  %v1074_v26 = vmul.f32 %v3118_v55, %v3118_v55  ;;  %v1884_v31 = vpop.f32.mrb[37].mxu1  ;;  %v1108_v51 = vmul.f32 %v3120_v0, %v3120_v0 }
 0x1c3   : > { %v3124_v48 = vpop.f32.mrb[38].mxu0  ;;  %v3126_v6 = vpop.f32.mrb[38].mxu1 }
 0x1c4   : > { %1224 = vadd.xlane.f32.xlu1 %v1107_v5  ;;  %1158 = vadd.xlane.f32.xlu0 %v1074_v26  ;;  %v1817_v50 = vpop.f32.mrb[39].mxu0  ;;  %v1885_v58 = vpop.f32.mrb[39].mxu1  ;;  %v1075_v19 = vmul.f32 %v3124_v48, %v3124_v48  ;;  %v1109_v14 = vmul.f32 %v3126_v6, %v3126_v6 }
 0x1c8   : > { %1226 = vadd.xlane.f32.xlu0 %v1108_v51  ;;  %1160 = vadd.xlane.f32.xlu1 %v1075_v19 }
 0x1c9   : > { %v3134_v43 = vpop.f32.mrb[40].mxu0  ;;  %v3136_v56 = vpop.f32.mrb[40].mxu1 }
 0x1ca   : > { %v1820_v63 = vpop.f32.mrb[41].mxu0  ;;  %v1076_v12 = vmul.f32 %v3134_v43, %v3134_v43  ;;  %v1888_v27 = vpop.f32.mrb[41].mxu1  ;;  %v1110_v7 = vmul.f32 %v3136_v56, %v3136_v56 }
 0x1cb   : > { %v3140_v16 = vpop.f32.mrb[42].mxu0  ;;  %v3142_v57 = vpop.f32.mrb[42].mxu1 }
 0x1cc   : > { %1228 = vadd.xlane.f32.xlu1 %v1109_v14  ;;  %1162 = vadd.xlane.f32.xlu0 %v1076_v12  ;;  %v1821_v60 = vpop.f32.mrb[43].mxu0  ;;  %v1889_v18 = vpop.f32.mrb[43].mxu1  ;;  %v1077_v3 = vmul.f32 %v3140_v16, %v3140_v16  ;;  %v1111_v21 = vmul.f32 %v3142_v57, %v3142_v57 }
 0x1d0   : > { %1230 = vadd.xlane.f32.xlu0 %v1110_v7  ;;  %1164 = vadd.xlane.f32.xlu1 %v1077_v3 }
 0x1d1   : > { %v3150_v23 = vpop.f32.mrb[44].mxu0  ;;  %v3152_v34 = vpop.f32.mrb[44].mxu1 }
 0x1d2   : > { %v1824_v30 = vpop.f32.mrb[45].mxu0  ;;  %v1078_v5 = vmul.f32 %v3150_v23, %v3150_v23  ;;  %v1892_v40 = vpop.f32.mrb[45].mxu1  ;;  %v1112_v51 = vmul.f32 %v3152_v34, %v3152_v34 }
 0x1d3   : > { %v3156_v26 = vpop.f32.mrb[46].mxu0  ;;  %v3158_v31 = vpop.f32.mrb[46].mxu1 }
 0x1d4   : > { %1232 = vadd.xlane.f32.xlu1 %v1111_v21  ;;  %1166 = vadd.xlane.f32.xlu0 %v1078_v5  ;;  %v1825_v50 = vpop.f32.mrb[47].mxu0  ;;  %v1893_v58 = vpop.f32.mrb[47].mxu1  ;;  %v1079_v19 = vmul.f32 %v3156_v26, %v3156_v26  ;;  %v1113_v14 = vmul.f32 %v3158_v31, %v3158_v31 }
 0x1d8   : > { %1234 = vadd.xlane.f32.xlu0 %v1112_v51  ;;  %1168 = vadd.xlane.f32.xlu1 %v1079_v19 }
 0x1d9   : > { %v3166_v63 = vpop.f32.mrb[48].mxu0  ;;  %v3168_v12 = vpop.f32.mrb[48].mxu1 }
 0x1da   : > { %3512 = vst [vmem:[#allocation17_spill] sm:$0xff] %v3168_v12  ;;  %v1828_v27 = vpop.f32.mrb[49].mxu0  ;;  %v1080_v60 = vmul.f32 %v3166_v63, %v3166_v63  ;;  %v1896_v7 = vpop.f32.mrb[49].mxu1  ;;  %v1114_v30 = vmul.f32 %v3168_v12, %v3168_v12 }
 0x1db   : > { %v3172_v18 = vpop.f32.mrb[50].mxu0  ;;  %v3174_v3 = vpop.f32.mrb[50].mxu1 }
 0x1dc   : > { %3513 = vst [vmem:[#allocation18_spill] sm:$0xff] %v3172_v18  ;;  %3514 = vst [vmem:[#allocation19_spill] sm:$0xff] %v3174_v3  ;;  %1236 = vadd.xlane.f32.xlu1 %v1113_v14  ;;  %1170 = vadd.xlane.f32.xlu0 %v1080_v60  ;;  %v1829_v21 = vpop.f32.mrb[51].mxu0  ;;  %v1897_v5 = vpop.f32.mrb[51].mxu1  ;;  %v1081_v40 = vmul.f32 %v3172_v18, %v3172_v18  ;;  %v1115_v50 = vmul.f32 %v3174_v3, %v3174_v3 }
 0x1e0   : > { %1238 = vadd.xlane.f32.xlu0 %v1114_v30  ;;  %1172 = vadd.xlane.f32.xlu1 %v1081_v40 }
 0x1e1   : > { %v3182_v51 = vpop.f32.mrb[52].mxu0  ;;  %v3184_v58 = vpop.f32.mrb[52].mxu1 }
 0x1e2   : > { %3515 = vst [vmem:[#allocation20_spill] sm:$0xff] %v3182_v51  ;;  %3516 = vst [vmem:[#allocation21_spill] sm:$0xff] %v3184_v58  ;;  %v1832_v19 = vpop.f32.mrb[53].mxu0  ;;  %v1082_v14 = vmul.f32 %v3182_v51, %v3182_v51  ;;  %v1900_v27 = vpop.f32.mrb[53].mxu1  ;;  %v1116_v30 = vmul.f32 %v3184_v58, %v3184_v58 }
 0x1e3   : > { %v3188_v60 = vpop.f32.mrb[54].mxu0  ;;  %v3190_v7 = vpop.f32.mrb[54].mxu1 }
 0x1e4   : > { %3517 = vst [vmem:[#allocation22_spill] sm:$0xff] %v3188_v60  ;;  %3518 = vst [vmem:[#allocation23_spill] sm:$0xff] %v3190_v7  ;;  %1240 = vadd.xlane.f32.xlu1 %v1115_v50  ;;  %1174 = vadd.xlane.f32.xlu0 %v1082_v14  ;;  %v1833_v21 = vpop.f32.mrb[55].mxu0  ;;  %v1901_v5 = vpop.f32.mrb[55].mxu1  ;;  %v1083_v40 = vmul.f32 %v3188_v60, %v3188_v60  ;;  %v1117_v19 = vmul.f32 %v3190_v7, %v3190_v7 }
 0x1e8   : > { %1242 = vadd.xlane.f32.xlu0 %v1116_v30  ;;  %1176 = vadd.xlane.f32.xlu1 %v1083_v40 }
 0x1e9   : > { %v3198_v27 = vpop.f32.mrb[56].mxu0  ;;  %v3200_v51 = vpop.f32.mrb[56].mxu1 }
 0x1ea   : > { %3519 = vst [vmem:[#allocation24_spill] sm:$0xff] %v3198_v27  ;;  %3520 = vst [vmem:[#allocation25_spill] sm:$0xff] %v3200_v51  ;;  %v1836_v3 = vpop.f32.mrb[57].mxu0  ;;  %v1084_v50 = vmul.f32 %v3198_v27, %v3198_v27  ;;  %v1904_v14 = vpop.f32.mrb[57].mxu1  ;;  %v1118_v40 = vmul.f32 %v3200_v51, %v3200_v51 }
 0x1eb   : > { %v3204_v21 = vpop.f32.mrb[58].mxu0  ;;  %v3206_v5 = vpop.f32.mrb[58].mxu1 }
 0x1ec   : > { %3521 = vst [vmem:[#allocation26_spill] sm:$0xff] %v3204_v21  ;;  %3522 = vst [vmem:[#allocation27_spill] sm:$0xff] %v3206_v5  ;;  %1244 = vadd.xlane.f32.xlu1 %v1117_v19  ;;  %1178 = vadd.xlane.f32.xlu0 %v1084_v50  ;;  %v1837_v30 = vpop.f32.mrb[59].mxu0  ;;  %v1905_v7 = vpop.f32.mrb[59].mxu1  ;;  %v1085_v60 = vmul.f32 %v3204_v21, %v3204_v21  ;;  %v1119_v3 = vmul.f32 %v3206_v5, %v3206_v5 }
 0x1f0   : > { %1246 = vadd.xlane.f32.xlu0 %v1118_v40  ;;  %1180 = vadd.xlane.f32.xlu1 %v1085_v60 }
 0x1f1   : > { %v3214_v14 = vpop.f32.mrb[60].mxu0  ;;  %v3216_v27 = vpop.f32.mrb[60].mxu1 }
 0x1f2   : > { %3523 = vst [vmem:[#allocation28_spill] sm:$0xff] %v3214_v14  ;;  %3524 = vst [vmem:[#allocation29_spill] sm:$0xff] %v3216_v27  ;;  %v1840_v58 = vpop.f32.mrb[61].mxu0  ;;  %v1086_v19 = vmul.f32 %v3214_v14, %v3214_v14  ;;  %v1908_v50 = vpop.f32.mrb[61].mxu1 }
 0x1f3   : > { %v3220_v30 = vpop.f32.mrb[62].mxu0  ;;  %v3222_v7 = vpop.f32.mrb[62].mxu1 }
 0x1f4   : > { %3525 = vst [vmem:[#allocation30_spill] sm:$0xff] %v3220_v30  ;;  %3526 = vst [vmem:[#allocation31_spill] sm:$0xff] %v3222_v7  ;;  %1248 = vadd.xlane.f32.xlu1 %v1119_v3  ;;  %1182 = vadd.xlane.f32.xlu0 %v1086_v19  ;;  %v1841_v40 = vpop.f32.mrb[63].mxu0  ;;  %v1909_v60 = vpop.f32.mrb[63].mxu1  ;;  %v1087_v5 = vmul.f32 %v3220_v30, %v3220_v30  ;;  %v1120_v19 = vmul.f32 %v3216_v27, %v3216_v27 }
 0x1f8   : > { %1184 = vadd.xlane.f32.xlu1 %v1087_v5  ;;  %v1121_v5 = vmul.f32 %v3222_v7, %v3222_v7 }
 0x1f9   : > { %v3226_v21 = vpop.f32.mrb[64].mxu0 }
 0x1fa   : > { %3527 = vst [vmem:[#allocation32_spill] sm:$0xff] %v3226_v21  ;;  %v1844_v51 = vpop.f32.mrb[65].mxu0  ;;  %v1088_v58 = vmul.f32 %v3226_v21, %v3226_v21 }
 0x1fb   : > { %v3230_v14 = vpop.f32.mrb[66].mxu0 }
 0x1fc   : > { %3528 = vst [vmem:[#allocation33_spill] sm:$0xff] %v3230_v14  ;;  %1186 = vadd.xlane.f32.xlu0 %v1088_v58  ;;  %v1845_v50 = vpop.f32.mrb[67].mxu0  ;;  %v1089_v3 = vmul.f32 %v3230_v14, %v3230_v14 }
 0x1fe   : > { %1188 = vadd.xlane.f32.xlu1 %v1089_v3 }
 0x200   : > { %1250 = vadd.xlane.f32.xlu0 %v1120_v19 }
 0x202   : > { %1252 = vadd.xlane.f32.xlu1 %v1121_v5 }
 0x209   : > { %v1123_v51 = vpop.xlane.xlu0 %1122 }
 0x20a   : > { %v1254_v40 = vmax.f32 %v1123_v51, 1e-24 }
 0x20b   : > { %v1193_v60 = vpop.xlane.xlu1 %1192 }
 0x20c   : > { %2013 = vrsqrt.f32 %v1254_v40  ;;  %v1289_v21 = vmax.f32 %v1193_v60, 1e-24 }
 0x20d   : > { %v1191_v30 = vpop.xlane.xlu0 %1190 }
 0x20e   : > { %2015 = vrsqrt.f32 %v1289_v21  ;;  %v1288_v58 = vmax.f32 %v1191_v30, 1e-24 }
 0x210   : > { %2017 = vrsqrt.f32 %v1288_v58 }
 0x211   : > { %v1125_v50 = vpop.xlane.xlu0 %1124  ;;  %v1127_v14 = vpop.xlane.xlu1 %1126 }
 0x212   : > { %v1255_v18 = vmax.f32 %v1125_v50, 1e-24  ;;  %v1256_v27 = vmax.f32 %v1127_v14, 1e-24 }
 0x214   : > { %2019 = vrsqrt.f32 %v1255_v18 }
 0x215   : > { %2021 = vrsqrt.f32 %v1256_v27  ;;  %v1195_v3 = vpop.xlane.xlu0 %1194  ;;  %v1129_v19 = vpop.xlane.xlu1 %1128 }
 0x216   : > { %v2014_v7 = vpop.eup %2013  ;;  %v1290_v5 = vmax.f32 %v1195_v3, 1e-24  ;;  %v1257_v12 = vmax.f32 %v1129_v19, 1e-24 }
 0x217   : > { %v1386_v51 = vmul.f32 %v2014_v7, %v2974_v37 }
 0x218   : > { %v2016_v40 = vpop.eup %2015  ;;  %2023 = vrsqrt.f32 %v1290_v5 }
 0x219   : > { %1452 = vst [vmem:[%s3241_s21] sm:$0xff] %v1386_v51  ;;  %v1421_v21 = vmul.f32 %v2016_v40, %v2982_v47  ;;  %2025 = vrsqrt.f32 %v1257_v12  ;;  %v1197_v18 = vpop.xlane.xlu1 %1196  ;;  %v1131_v27 = vpop.xlane.xlu0 %1130 }
 0x21a   : > { %v2018_v14 = vpop.eup %2017  ;;  %v1291_v30 = vmax.f32 %v1197_v18, 1e-24  ;;  %v1258_v60 = vmax.f32 %v1131_v27, 1e-24 }
 0x21b   : > { %1487 = vst [vmem:[%s3241_s21 + $0x118] sm:$0xff] %v1421_v21  ;;  %v1420_v37 = vmul.f32 %v2018_v14, %v2976_v38 }
 0x21c   : > { %2027 = vrsqrt.f32 %v1291_v30 }
 0x21d   : > { %1486 = vst [vmem:[%s3241_s21 + $0x110] sm:$0xff] %v1420_v37  ;;  %2029 = vrsqrt.f32 %v1258_v60  ;;  %v1199_v7 = vpop.xlane.xlu0 %1198  ;;  %v1133_v58 = vpop.xlane.xlu1 %1132 }
 0x21e   : > { %v2020_v50 = vpop.eup %2019  ;;  %v1292_v3 = vmax.f32 %v1199_v7, 1e-24  ;;  %v1259_v19 = vmax.f32 %v1133_v58, 1e-24 }
 0x21f   : > { %v2022_v47 = vpop.eup %2021  ;;  %v1387_v12 = vmul.f32 %v2020_v50, %v2980_v39 }
 0x220   : > { %v1388_v5 = vmul.f32 %v2022_v47, %v2988_v41  ;;  %2031 = vrsqrt.f32 %v1292_v3 }
 0x221   : > { %1453 = vst [vmem:[%s3241_s21 + $0x8] sm:$0xff] %v1387_v12  ;;  %2033 = vrsqrt.f32 %v1259_v19  ;;  %v1201_v38 = vpop.xlane.xlu1 %1200  ;;  %v1135_v51 = vpop.xlane.xlu0 %1134 }
 0x222   : > { %v2024_v40 = vpop.eup %2023  ;;  %1454 = vst [vmem:[%s3241_s21 + $0x10] sm:$0xff] %v1388_v5  ;;  %v1293_v21 = vmax.f32 %v1201_v38, 1e-24  ;;  %v1260_v18 = vmax.f32 %v1135_v51, 1e-24 }
 0x223   : > { %v2026_v27 = vpop.eup %2025  ;;  %v1422_v14 = vmul.f32 %v2024_v40, %v2990_v42 }
 0x224   : > { %v1389_v30 = vmul.f32 %v2026_v27, %v2996_v28  ;;  %2035 = vrsqrt.f32 %v1293_v21 }
 0x225   : > { %1488 = vst [vmem:[%s3241_s21 + $0x120] sm:$0xff] %v1422_v14  ;;  %2037 = vrsqrt.f32 %v1260_v18  ;;  %v1203_v39 = vpop.xlane.xlu0 %1202  ;;  %v1137_v41 = vpop.xlane.xlu1 %1136 }
 0x226   : > { %v2028_v60 = vpop.eup %2027  ;;  %1455 = vst [vmem:[%s3241_s21 + $0x18] sm:$0xff] %v1389_v30  ;;  %v1294_v37 = vmax.f32 %v1203_v39, 1e-24  ;;  %v1261_v7 = vmax.f32 %v1137_v41, 1e-24 }
 0x227   : > { %v2030_v58 = vpop.eup %2029  ;;  %v1423_v50 = vmul.f32 %v2028_v60, %v2998_v9 }
 0x228   : > { %v1390_v3 = vmul.f32 %v2030_v58, %v3006_v10  ;;  %2039 = vrsqrt.f32 %v1294_v37 }
 0x229   : > { %1489 = vst [vmem:[%s3241_s21 + $0x128] sm:$0xff] %v1423_v50  ;;  %2041 = vrsqrt.f32 %v1261_v7  ;;  %v1205_v42 = vpop.xlane.xlu1 %1204  ;;  %v1139_v28 = vpop.xlane.xlu0 %1138 }
 0x22a   : > { %v2032_v19 = vpop.eup %2031  ;;  %1456 = vst [vmem:[%s3241_s21 + $0x20] sm:$0xff] %v1390_v3  ;;  %v1295_v47 = vmax.f32 %v1205_v42, 1e-24  ;;  %v1262_v12 = vmax.f32 %v1139_v28, 1e-24 }
 0x22b   : > { %v2034_v5 = vpop.eup %2033  ;;  %v1424_v38 = vmul.f32 %v2032_v19, %v3008_v52 }
 0x22c   : > { %v1391_v51 = vmul.f32 %v2034_v5, %v3012_v11  ;;  %2043 = vrsqrt.f32 %v1295_v47 }
 0x22d   : > { %1490 = vst [vmem:[%s3241_s21 + $0x130] sm:$0xff] %v1424_v38  ;;  %2045 = vrsqrt.f32 %v1262_v12  ;;  %v1207_v9 = vpop.xlane.xlu0 %1206  ;;  %v1141_v10 = vpop.xlane.xlu1 %1140 }
 0x22e   : > { %v2036_v40 = vpop.eup %2035  ;;  %1457 = vst [vmem:[%s3241_s21 + $0x28] sm:$0xff] %v1391_v51  ;;  %v1296_v21 = vmax.f32 %v1207_v9, 1e-24  ;;  %v1263_v18 = vmax.f32 %v1141_v10, 1e-24 }
 0x22f   : > { %v2038_v27 = vpop.eup %2037  ;;  %v1425_v14 = vmul.f32 %v2036_v40, %v3014_v46 }
 0x230   : > { %v1392_v30 = vmul.f32 %v2038_v27, %v3022_v53  ;;  %2047 = vrsqrt.f32 %v1296_v21 }
 0x231   : > { %1491 = vst [vmem:[%s3241_s21 + $0x138] sm:$0xff] %v1425_v14  ;;  %2049 = vrsqrt.f32 %v1263_v18  ;;  %v1209_v52 = vpop.xlane.xlu1 %1208  ;;  %v1143_v11 = vpop.xlane.xlu0 %1142 }
 0x232   : > { %v2040_v39 = vpop.eup %2039  ;;  %1458 = vst [vmem:[%s3241_s21 + $0x30] sm:$0xff] %v1392_v30  ;;  %v1297_v41 = vmax.f32 %v1209_v52, 1e-24  ;;  %v1264_v60 = vmax.f32 %v1143_v11, 1e-24 }
 0x233   : > { %v2042_v37 = vpop.eup %2041  ;;  %v1426_v7 = vmul.f32 %v2040_v39, %v3024_v33 }
 0x234   : > { %v1393_v58 = vmul.f32 %v2042_v37, %v3028_v4  ;;  %2051 = vrsqrt.f32 %v1297_v41 }
 0x235   : > { %1492 = vst [vmem:[%s3241_s21 + $0x140] sm:$0xff] %v1426_v7  ;;  %2053 = vrsqrt.f32 %v1264_v60  ;;  %v1211_v46 = vpop.xlane.xlu0 %1210  ;;  %v1145_v53 = vpop.xlane.xlu1 %1144 }
 0x236   : > { %v2044_v50 = vpop.eup %2043  ;;  %1459 = vst [vmem:[%s3241_s21 + $0x38] sm:$0xff] %v1393_v58  ;;  %v1298_v3 = vmax.f32 %v1211_v46, 1e-24  ;;  %v1265_v42 = vmax.f32 %v1145_v53, 1e-24 }
 0x237   : > { %v2046_v28 = vpop.eup %2045  ;;  %v1427_v19 = vmul.f32 %v2044_v50, %v3030_v8 }
 0x238   : > { %v1394_v47 = vmul.f32 %v2046_v28, %v3038_v13  ;;  %2055 = vrsqrt.f32 %v1298_v3 }
 0x239   : > { %1493 = vst [vmem:[%s3241_s21 + $0x148] sm:$0xff] %v1427_v19  ;;  %2057 = vrsqrt.f32 %v1265_v42  ;;  %v1213_v33 = vpop.xlane.xlu1 %1212  ;;  %v1147_v4 = vpop.xlane.xlu0 %1146 }
 0x23a   : > { %v2048_v12 = vpop.eup %2047  ;;  %1460 = vst [vmem:[%s3241_s21 + $0x40] sm:$0xff] %v1394_v47  ;;  %v1299_v5 = vmax.f32 %v1213_v33, 1e-24  ;;  %v1266_v38 = vmax.f32 %v1147_v4, 1e-24 }
 0x23b   : > { %v2050_v51 = vpop.eup %2049  ;;  %v1428_v9 = vmul.f32 %v2048_v12, %v3040_v54 }
 0x23c   : > { %v1395_v10 = vmul.f32 %v2050_v51, %v3044_v20  ;;  %2059 = vrsqrt.f32 %v1299_v5 }
 0x23d   : > { %1494 = vst [vmem:[%s3241_s21 + $0x150] sm:$0xff] %v1428_v9  ;;  %2061 = vrsqrt.f32 %v1266_v38  ;;  %v1215_v8 = vpop.xlane.xlu0 %1214  ;;  %v1149_v13 = vpop.xlane.xlu1 %1148 }
 0x23e   : > { %v2052_v40 = vpop.eup %2051  ;;  %1461 = vst [vmem:[%s3241_s21 + $0x48] sm:$0xff] %v1395_v10  ;;  %v1300_v21 = vmax.f32 %v1215_v8, 1e-24  ;;  %v1267_v18 = vmax.f32 %v1149_v13, 1e-24 }
 0x23f   : > { %v2054_v27 = vpop.eup %2053  ;;  %v1429_v14 = vmul.f32 %v2052_v40, %v3046_v17 }
 0x240   : > { %v1396_v30 = vmul.f32 %v2054_v27, %v3054_v62  ;;  %2063 = vrsqrt.f32 %v1300_v21 }
 0x241   : > { %1495 = vst [vmem:[%s3241_s21 + $0x158] sm:$0xff] %v1429_v14  ;;  %2065 = vrsqrt.f32 %v1267_v18  ;;  %v1217_v54 = vpop.xlane.xlu1 %1216  ;;  %v1151_v20 = vpop.xlane.xlu0 %1150 }
 0x242   : > { %v2056_v52 = vpop.eup %2055  ;;  %1462 = vst [vmem:[%s3241_s21 + $0x50] sm:$0xff] %v1396_v30  ;;  %v1301_v11 = vmax.f32 %v1217_v54, 1e-24  ;;  %v1268_v39 = vmax.f32 %v1151_v20, 1e-24 }
 0x243   : > { %v2058_v41 = vpop.eup %2057  ;;  %v1430_v60 = vmul.f32 %v2056_v52, %v3056_v22 }
 0x244   : > { %v1397_v37 = vmul.f32 %v2058_v41, %v3060_v35  ;;  %2067 = vrsqrt.f32 %v1301_v11 }
 0x245   : > { %1496 = vst [vmem:[%s3288_s7] sm:$0xff] %v1430_v60  ;;  %2069 = vrsqrt.f32 %v1268_v39  ;;  %v1219_v17 = vpop.xlane.xlu0 %1218  ;;  %v1153_v62 = vpop.xlane.xlu1 %1152 }
 0x246   : > { %v2060_v7 = vpop.eup %2059  ;;  %1463 = vst [vmem:[%s3241_s21 + $0x58] sm:$0xff] %v1397_v37  ;;  %v1302_v58 = vmax.f32 %v1219_v17, 1e-24  ;;  %v1269_v46 = vmax.f32 %v1153_v62, 1e-24 }
 0x247   : > { %v2062_v53 = vpop.eup %2061  ;;  %v1431_v22 = vmul.f32 %v2060_v7, %v3062_v36 }
 0x248   : > { %v1398_v35 = vmul.f32 %v2062_v53, %v3070_v44  ;;  %2071 = vrsqrt.f32 %v1302_v58 }
 0x249   : > { %1497 = vst [vmem:[%s3288_s7 + $0x8] sm:$0xff] %v1431_v22  ;;  %2073 = vrsqrt.f32 %v1269_v46  ;;  %v1221_v50 = vpop.xlane.xlu1 %1220  ;;  %v1155_v3 = vpop.xlane.xlu0 %1154 }
 0x24a   : > { %v2064_v42 = vpop.eup %2063  ;;  %1464 = vst [vmem:[%s3241_s21 + $0x60] sm:$0xff] %v1398_v35  ;;  %v1303_v28 = vmax.f32 %v1221_v50, 1e-24  ;;  %v1270_v19 = vmax.f32 %v1155_v3, 1e-24 }
 0x24b   : > { %v2066_v47 = vpop.eup %2065  ;;  %v1432_v33 = vmul.f32 %v2064_v42, %v3072_v45 }
 0x24c   : > { %v1399_v4 = vmul.f32 %v2066_v47, %v3076_v32  ;;  %2075 = vrsqrt.f32 %v1303_v28 }
 0x24d   : > { %1498 = vst [vmem:[%s3288_s7 + $0x10] sm:$0xff] %v1432_v33  ;;  %2077 = vrsqrt.f32 %v1270_v19  ;;  %v1223_v36 = vpop.xlane.xlu0 %1222  ;;  %v1157_v44 = vpop.xlane.xlu1 %1156 }
 0x24e   : > { %v2068_v12 = vpop.eup %2067  ;;  %1465 = vst [vmem:[%s3241_s21 + $0x68] sm:$0xff] %v1399_v4  ;;  %v1304_v5 = vmax.f32 %v1223_v36, 1e-24  ;;  %v1271_v38 = vmax.f32 %v1157_v44, 1e-24 }
 0x24f   : > { %v2070_v51 = vpop.eup %2069  ;;  %v1433_v9 = vmul.f32 %v2068_v12, %v3078_v49 }
 0x250   : > { %v1400_v10 = vmul.f32 %v2070_v51, %v3086_v59  ;;  %2079 = vrsqrt.f32 %v1304_v5 }
 0x251   : > { %1499 = vst [vmem:[%s3288_s7 + $0x18] sm:$0xff] %v1433_v9  ;;  %2081 = vrsqrt.f32 %v1271_v38  ;;  %v1225_v45 = vpop.xlane.xlu1 %1224  ;;  %v1159_v32 = vpop.xlane.xlu0 %1158 }
 0x252   : > { %v2072_v8 = vpop.eup %2071  ;;  %1466 = vst [vmem:[%s3241_s21 + $0x70] sm:$0xff] %v1400_v10  ;;  %v1305_v13 = vmax.f32 %v1225_v45, 1e-24  ;;  %v1272_v40 = vmax.f32 %v1159_v32, 1e-24 }
 0x253   : > { %v2074_v21 = vpop.eup %2073  ;;  %v1434_v18 = vmul.f32 %v2072_v8, %v3088_v25 }
 0x254   : > { %v1401_v27 = vmul.f32 %v2074_v21, %v3092_v1  ;;  %2083 = vrsqrt.f32 %v1305_v13 }
 0x255   : > { %1500 = vst [vmem:[%s3288_s7 + $0x20] sm:$0xff] %v1434_v18  ;;  %2085 = vrsqrt.f32 %v1272_v40  ;;  %v1227_v49 = vpop.xlane.xlu0 %1226  ;;  %v1161_v59 = vpop.xlane.xlu1 %1160 }
 0x256   : > { %v2076_v14 = vpop.eup %2075  ;;  %1467 = vst [vmem:[%s3241_s21 + $0x78] sm:$0xff] %v1401_v27  ;;  %v1306_v30 = vmax.f32 %v1227_v49, 1e-24  ;;  %v1273_v54 = vmax.f32 %v1161_v59, 1e-24 }
 0x257   : > { %v2078_v20 = vpop.eup %2077  ;;  %v1435_v52 = vmul.f32 %v2076_v14, %v3094_v2 }
 0x258   : > { %v1402_v11 = vmul.f32 %v2078_v20, %v3102_v15  ;;  %2087 = vrsqrt.f32 %v1306_v30 }
 0x259   : > { %1501 = vst [vmem:[%s3288_s7 + $0x28] sm:$0xff] %v1435_v52  ;;  %2089 = vrsqrt.f32 %v1273_v54  ;;  %v1229_v25 = vpop.xlane.xlu1 %1228  ;;  %v1163_v1 = vpop.xlane.xlu0 %1162 }
 0x25a   : > { %v2080_v39 = vpop.eup %2079  ;;  %1468 = vst [vmem:[%s3241_s21 + $0x80] sm:$0xff] %v1402_v11  ;;  %v1307_v41 = vmax.f32 %v1229_v25, 1e-24  ;;  %v1274_v60 = vmax.f32 %v1163_v1, 1e-24 }
 0x25b   : > { %v2082_v37 = vpop.eup %2081  ;;  %v1436_v17 = vmul.f32 %v2080_v39, %v3104_v24 }
 0x25c   : > { %v1403_v62 = vmul.f32 %v2082_v37, %v3108_v29  ;;  %2091 = vrsqrt.f32 %v1307_v41 }
 0x25d   : > { %1502 = vst [vmem:[%s3288_s7 + $0x30] sm:$0xff] %v1436_v17  ;;  %2093 = vrsqrt.f32 %v1274_v60  ;;  %v1231_v2 = vpop.xlane.xlu0 %1230  ;;  %v1165_v15 = vpop.xlane.xlu1 %1164 }
 0x25e   : > { %v2084_v7 = vpop.eup %2083  ;;  %1469 = vst [vmem:[%s3241_s21 + $0x88] sm:$0xff] %v1403_v62  ;;  %v1308_v58 = vmax.f32 %v1231_v2, 1e-24  ;;  %v1275_v46 = vmax.f32 %v1165_v15, 1e-24  ;;  %v3529_v2 = vld [vmem:[#allocation17_spill] sm:$0xff] }
 0x25f   : > { %v2086_v53 = vpop.eup %2085  ;;  %v1437_v22 = vmul.f32 %v2084_v7, %v3110_v61  ;;  %v3530_v7 = vld [vmem:[#allocation18_spill] sm:$0xff] }
 0x260   : > { %v1404_v35 = vmul.f32 %v2086_v53, %v3118_v55  ;;  %2095 = vrsqrt.f32 %v1308_v58 }
 0x261   : > { %1503 = vst [vmem:[%s3288_s7 + $0x38] sm:$0xff] %v1437_v22  ;;  %2097 = vrsqrt.f32 %v1275_v46  ;;  %v1233_v24 = vpop.xlane.xlu1 %1232  ;;  %v1167_v29 = vpop.xlane.xlu0 %1166 }
 0x262   : > { %v2088_v50 = vpop.eup %2087  ;;  %1470 = vst [vmem:[%s3241_s21 + $0x90] sm:$0xff] %v1404_v35  ;;  %v1309_v3 = vmax.f32 %v1233_v24, 1e-24  ;;  %v1276_v42 = vmax.f32 %v1167_v29, 1e-24  ;;  %v3531_v24 = vld [vmem:[#allocation19_spill] sm:$0xff] }
 0x263   : > { %v2090_v28 = vpop.eup %2089  ;;  %v1438_v19 = vmul.f32 %v2088_v50, %v3120_v0  ;;  %v3532_v50 = vld [vmem:[#allocation20_spill] sm:$0xff] }
 0x264   : > { %v1405_v47 = vmul.f32 %v2090_v28, %v3124_v48  ;;  %2099 = vrsqrt.f32 %v1309_v3 }
 0x265   : > { %1504 = vst [vmem:[%s3288_s7 + $0x40] sm:$0xff] %v1438_v19  ;;  %2101 = vrsqrt.f32 %v1276_v42  ;;  %v1235_v61 = vpop.xlane.xlu0 %1234  ;;  %v1169_v55 = vpop.xlane.xlu1 %1168 }
 0x266   : > { %v2092_v33 = vpop.eup %2091  ;;  %1471 = vst [vmem:[%s3241_s21 + $0x98] sm:$0xff] %v1405_v47  ;;  %v1310_v4 = vmax.f32 %v1235_v61, 1e-24  ;;  %v1277_v36 = vmax.f32 %v1169_v55, 1e-24 }
 0x267   : > { %v2094_v44 = vpop.eup %2093  ;;  %v1439_v12 = vmul.f32 %v2092_v33, %v3126_v6  ;;  %v3533_v33 = vld [vmem:[#allocation21_spill] sm:$0xff] }
 0x268   : > { %v1406_v5 = vmul.f32 %v2094_v44, %v3134_v43  ;;  %2103 = vrsqrt.f32 %v1310_v4 }
 0x269   : > { %1505 = vst [vmem:[%s3288_s7 + $0x48] sm:$0xff] %v1439_v12  ;;  %2105 = vrsqrt.f32 %v1277_v36  ;;  %v1237_v0 = vpop.xlane.xlu1 %1236  ;;  %v1171_v48 = vpop.xlane.xlu0 %1170  ;;  %v3534_v36 = vld [vmem:[#allocation22_spill] sm:$0xff] }
 0x26a   : > { %v2096_v38 = vpop.eup %2095  ;;  %1472 = vst [vmem:[%s3241_s21 + $0xa0] sm:$0xff] %v1406_v5  ;;  %v1311_v51 = vmax.f32 %v1237_v0, 1e-24  ;;  %v1278_v9 = vmax.f32 %v1171_v48, 1e-24 }
 0x26b   : > { %v2098_v10 = vpop.eup %2097  ;;  %v1440_v45 = vmul.f32 %v2096_v38, %v3136_v56  ;;  %v3535_v38 = vld [vmem:[#allocation23_spill] sm:$0xff] }
 0x26c   : > { %v1407_v32 = vmul.f32 %v2098_v10, %v3140_v16  ;;  %2107 = vrsqrt.f32 %v1311_v51 }
 0x26d   : > { %1506 = vst [vmem:[%s3288_s7 + $0x50] sm:$0xff] %v1440_v45  ;;  %2109 = vrsqrt.f32 %v1278_v9  ;;  %v1239_v6 = vpop.xlane.xlu0 %1238  ;;  %v1173_v43 = vpop.xlane.xlu1 %1172  ;;  %v3536_v9 = vld [vmem:[#allocation24_spill] sm:$0xff] }
 0x26e   : > { %v2100_v8 = vpop.eup %2099  ;;  %1473 = vst [vmem:[%s3241_s21 + $0xa8] sm:$0xff] %v1407_v32  ;;  %v1312_v13 = vmax.f32 %v1239_v6, 1e-24  ;;  %v1279_v40 = vmax.f32 %v1173_v43, 1e-24 }
 0x26f   : > { %v2102_v21 = vpop.eup %2101  ;;  %v1441_v18 = vmul.f32 %v2100_v8, %v3142_v57  ;;  %v3537_v8 = vld [vmem:[#allocation25_spill] sm:$0xff] }
 0x270   : > { %v1408_v27 = vmul.f32 %v2102_v21, %v3150_v23  ;;  %2111 = vrsqrt.f32 %v1312_v13  ;;  %v3538_v21 = vld [vmem:[#allocation26_spill] sm:$0xff] }
 0x271   : > { %1507 = vst [vmem:[%s3288_s7 + $0x58] sm:$0xff] %v1441_v18  ;;  %2113 = vrsqrt.f32 %v1279_v40  ;;  %v1241_v56 = vpop.xlane.xlu1 %1240  ;;  %v1175_v16 = vpop.xlane.xlu0 %1174 }
 0x272   : > { %v2104_v49 = vpop.eup %2103  ;;  %1474 = vst [vmem:[%s3241_s21 + $0xb0] sm:$0xff] %v1408_v27  ;;  %v1313_v59 = vmax.f32 %v1241_v56, 1e-24  ;;  %v1280_v14 = vmax.f32 %v1175_v16, 1e-24 }
 0x273   : > { %v2106_v30 = vpop.eup %2105  ;;  %v1442_v54 = vmul.f32 %v2104_v49, %v3152_v34 }
 0x274   : > { %v1409_v20 = vmul.f32 %v2106_v30, %v3156_v26  ;;  %2115 = vrsqrt.f32 %v1313_v59 }
 0x275   : > { %1508 = vst [vmem:[%s3288_s7 + $0x60] sm:$0xff] %v1442_v54  ;;  %2117 = vrsqrt.f32 %v1280_v14  ;;  %v1243_v57 = vpop.xlane.xlu0 %1242  ;;  %v1177_v23 = vpop.xlane.xlu1 %1176  ;;  %v3539_v14 = vld [vmem:[#allocation27_spill] sm:$0xff] }
 0x276   : > { %v2108_v52 = vpop.eup %2107  ;;  %1475 = vst [vmem:[%s3241_s21 + $0xb8] sm:$0xff] %v1409_v20  ;;  %v1314_v11 = vmax.f32 %v1243_v57, 1e-24  ;;  %v1281_v25 = vmax.f32 %v1177_v23, 1e-24  ;;  %v3540_v20 = vld [vmem:[#allocation28_spill] sm:$0xff] }
 0x277   : > { %v2110_v1 = vpop.eup %2109  ;;  %v1443_v39 = vmul.f32 %v2108_v52, %v3158_v31 }
 0x278   : > { %v1410_v41 = vmul.f32 %v2110_v1, %v3166_v63  ;;  %2119 = vrsqrt.f32 %v1314_v11  ;;  %v3541_v11 = vld [vmem:[#allocation30_spill] sm:$0xff] }
 0x279   : > { %1509 = vst [vmem:[%s3288_s7 + $0x68] sm:$0xff] %v1443_v39  ;;  %2121 = vrsqrt.f32 %v1281_v25  ;;  %v1245_v34 = vpop.xlane.xlu1 %1244  ;;  %v1179_v26 = vpop.xlane.xlu0 %1178  ;;  %v3542_v39 = vld [vmem:[#allocation32_spill] sm:$0xff] }
 0x27a   : > { %v2112_v60 = vpop.eup %2111  ;;  %1476 = vst [vmem:[%s3241_s21 + $0xc0] sm:$0xff] %v1410_v41  ;;  %v1315_v37 = vmax.f32 %v1245_v34, 1e-24  ;;  %v1282_v17 = vmax.f32 %v1179_v26, 1e-24  ;;  %v3543_v26 = vld [vmem:[#allocation33_spill] sm:$0xff] }
 0x27b   : > { %v2114_v62 = vpop.eup %2113  ;;  %v1444_v15 = vmul.f32 %v2112_v60, %v3529_v2 }
 0x27c   : > { %v1411_v58 = vmul.f32 %v2114_v62, %v3530_v7  ;;  %2123 = vrsqrt.f32 %v1315_v37 }
 0x27d   : > { %1510 = vst [vmem:[%s3288_s7 + $0x70] sm:$0xff] %v1444_v15  ;;  %2125 = vrsqrt.f32 %v1282_v17  ;;  %v1247_v31 = vpop.xlane.xlu0 %1246  ;;  %v1181_v63 = vpop.xlane.xlu1 %1180  ;;  %v3544_v17 = vld [vmem:[#allocation29_spill] sm:$0xff] }
 0x27e   : > { %v2116_v46 = vpop.eup %2115  ;;  %1477 = vst [vmem:[%s3241_s21 + $0xc8] sm:$0xff] %v1411_v58  ;;  %v1316_v53 = vmax.f32 %v1247_v31, 1e-24  ;;  %v1283_v22 = vmax.f32 %v1181_v63, 1e-24 }
 0x27f   : > { %v2118_v35 = vpop.eup %2117  ;;  %v1445_v29 = vmul.f32 %v2116_v46, %v3531_v24 }
 0x280   : > { %v1412_v3 = vmul.f32 %v2118_v35, %v3532_v50  ;;  %2127 = vrsqrt.f32 %v1316_v53 }
 0x281   : > { %1511 = vst [vmem:[%s3288_s7 + $0x78] sm:$0xff] %v1445_v29  ;;  %2129 = vrsqrt.f32 %v1283_v22  ;;  %v1249_v42 = vpop.xlane.xlu1 %1248  ;;  %v1183_v28 = vpop.xlane.xlu0 %1182 }
 0x282   : > { %v2120_v19 = vpop.eup %2119  ;;  %1478 = vst [vmem:[%s3241_s21 + $0xd0] sm:$0xff] %v1412_v3  ;;  %v1317_v47 = vmax.f32 %v1249_v42, 1e-24  ;;  %v1284_v61 = vmax.f32 %v1183_v28, 1e-24 }
 0x283   : > { %v2122_v55 = vpop.eup %2121  ;;  %v1446_v4 = vmul.f32 %v2120_v19, %v3533_v33 }
 0x284   : > { %v1413_v44 = vmul.f32 %v2122_v55, %v3534_v36  ;;  %2131 = vrsqrt.f32 %v1317_v47 }
 0x285   : > { %1512 = vst [vmem:[%s3288_s7 + $0x80] sm:$0xff] %v1446_v4  ;;  %2133 = vrsqrt.f32 %v1284_v61  ;;  %v1185_v12 = vpop.xlane.xlu1 %1184 }
 0x286   : > { %v2124_v5 = vpop.eup %2123  ;;  %1479 = vst [vmem:[%s3241_s21 + $0xd8] sm:$0xff] %v1413_v44  ;;  %v1285_v0 = vmax.f32 %v1185_v12, 1e-24 }
 0x287   : > { %v2126_v48 = vpop.eup %2125  ;;  %v1447_v51 = vmul.f32 %v2124_v5, %v3535_v38 }
 0x288   : > { %v1414_v10 = vmul.f32 %v2126_v48, %v3536_v9  ;;  %2135 = vrsqrt.f32 %v1285_v0 }
 0x289   : > { %1513 = vst [vmem:[%s3288_s7 + $0x88] sm:$0xff] %v1447_v51  ;;  %v1187_v45 = vpop.xlane.xlu0 %1186 }
 0x28a   : > { %v2128_v32 = vpop.eup %2127  ;;  %1480 = vst [vmem:[%s3241_s21 + $0xe0] sm:$0xff] %v1414_v10  ;;  %v1286_v6 = vmax.f32 %v1187_v45, 1e-24 }
 0x28b   : > { %v2130_v43 = vpop.eup %2129  ;;  %v1448_v13 = vmul.f32 %v2128_v32, %v3537_v8  ;;  %v1189_v40 = vpop.xlane.xlu1 %1188 }
 0x28c   : > { %v1415_v18 = vmul.f32 %v2130_v43, %v3538_v21  ;;  %2137 = vrsqrt.f32 %v1286_v6  ;;  %v1287_v27 = vmax.f32 %v1189_v40, 1e-24 }
 0x28d   : > { %1514 = vst [vmem:[%s3288_s7 + $0x90] sm:$0xff] %v1448_v13  ;;  %v1251_v56 = vpop.xlane.xlu0 %1250 }
 0x28e   : > { %v2132_v16 = vpop.eup %2131  ;;  %1481 = vst [vmem:[%s3241_s21 + $0xe8] sm:$0xff] %v1415_v18  ;;  %2139 = vrsqrt.f32 %v1287_v27  ;;  %v1318_v49 = vmax.f32 %v1251_v56, 1e-24 }
 0x28f   : > { %v2134_v59 = vpop.eup %2133  ;;  %v1449_v30 = vmul.f32 %v2132_v16, %v3539_v14  ;;  %v1253_v54 = vpop.xlane.xlu1 %1252 }
 0x290   : > { %v1416_v57 = vmul.f32 %v2134_v59, %v3540_v20  ;;  %2141 = vrsqrt.f32 %v1318_v49  ;;  %v1319_v23 = vmax.f32 %v1253_v54, 1e-24 }
 0x291   : > { %1515 = vst [vmem:[%s3288_s7 + $0x98] sm:$0xff] %v1449_v30 }
 0x292   : > { %v2136_v52 = vpop.eup %2135  ;;  %1482 = vst [vmem:[%s3241_s21 + $0xf0] sm:$0xff] %v1416_v57  ;;  %2143 = vrsqrt.f32 %v1319_v23 }
 0x293   : > { %v1417_v25 = vmul.f32 %v2136_v52, %v3541_v11 }
 0x295   : > { %1483 = vst [vmem:[%s3241_s21 + $0xf8] sm:$0xff] %v1417_v25 }
 0x296   : > { %v2138_v1 = vpop.eup %2137 }
 0x297   : > { %v1418_v41 = vmul.f32 %v2138_v1, %v3542_v39 }
 0x298   : > { %v2140_v34 = vpop.eup %2139 }
 0x299   : > { %1484 = vst [vmem:[%s3241_s21 + $0x100] sm:$0xff] %v1418_v41  ;;  %v1419_v60 = vmul.f32 %v2140_v34, %v3543_v26 }
 0x29a   : > { %v2142_v37 = vpop.eup %2141 }
 0x29b   : > { %1485 = vst [vmem:[%s3241_s21 + $0x108] sm:$0xff] %v1419_v60  ;;  %v1450_v62 = vmul.f32 %v2142_v37, %v3544_v17 }
 0x29c   : > { %v2144_v2 = vpop.eup %2143 }
 0x29d   : > { %2246 = shalt.err (!%p2243_p6)
}
 0x29e   : > { %s2247_s0 = scalar_lea.hbm %s3376_s20, 5632  ;;  %s2251_s12 = scalar_lea.hbm %s3475_s3, 11264 }
 0x29f   : > { %p2248_p8 = scmp.ne.s32.totalorder %s3376_s20, %s2247_s0  ;;  %p2252_p4 = scmp.lt.u32.totalorder %s3376_s20, %s3475_s3 }
 0x2a0   : > { %p2253_p11 = scmp.lt.u32.totalorder %s2251_s12, %s2247_s0  ;;  %p2255_p3 = scmp.lt.u32.totalorder %s2247_s0, %s3376_s20 }
 0x2a1   : > { %p2249_p10 = pnand %p2248_p8, %p2470_p12 }
 0x2a2   : > { %p2254_p13 = por %p2253_p11, %p2252_p4 }
 0x2a3   : > { %p2250_p0 = pneg %p2249_p10 }
 0x2a4   : > { %p2256_p7 = por %p2255_p3, %p2254_p13 }
 0x2a6   : > { %p2257_p9 = pnand %p2256_p7, %p2250_p0 }
 0x2a8   : > { %2260 = shalt.err (!%p2257_p9)
}
 0x2a9   : > { %s2351_s9 = smov 128   ;;  %s2352_s10 = smov 8   ;;  %1516 = vst [vmem:[%s3288_s7 + $0xa0] sm:$0xff] %v1450_v62  ;;  %v3545_v15 = vld [vmem:[#allocation31_spill] sm:$0xff] }
 0x2aa   : > { %1938 = dma.vmem_to_hbm [thread:$0]  (%p2470_p12), %s3378_s29, 5632, %s3376_s20, %s1519_s26, %s2351_s9, %s2351_s9, %s2352_s10   ;;  %v1451_v7 = vmul.f32 %v2144_v2, %v3545_v15 }
 0x2ab   : > { %s3420_s5 = scalar_lea.hbm %s3476_s4, %s1718_s13  ;;  %s1524_s28 = scalar_lea.sflag [#allocation11], %s2563_s2 }
 0x2ac   : > { %1517 = vst [vmem:[%s3288_s7 + $0xa8] sm:$0xff] %v1451_v7  ;;  %s2261_s0 = scalar_lea.vmem %s3424_s14, 2816  ;;  %s2353_s29 = smov [#allocation10]  }
 0x2ad   : > { %p2262_p2 = scmp.ne.s32.totalorder %s3424_s14, %s2261_s0  ;;  %s2265_s19 = sshll.u32 %s2353_s29, 4  ;;  %s2266_s19 = int_to_ptr.vmem [resolvable:$false] %s2265_s19 }
 0x2ae   : > { %s2267_s20 = scalar_lea.vmem %s2266_s19, 5632  ;;  %p2268_p6 = scmp.lt.s32.totalorder %s3424_s14, %s2266_s19 }
 0x2af   : > { %p2263_p5 = pnand %p2262_p2, %p2470_p12  ;;  %p2269_p8 = scmp.lt.s32.totalorder %s2267_s20, %s2261_s0 }
 0x2b1   : > { %p2264_p1 = pneg %p2263_p5  ;;  %p2270_p10 = por %p2269_p8, %p2268_p6 }
 0x2b3   : > { %p2271_p0 = pnand %p2270_p10, %p2264_p1 }
 0x2b5   : > { %2274 = shalt.err (!%p2271_p0)
}
 0x2b6   : > { %s2275_s7 = scalar_lea.hbm %s3420_s5, 2816  ;;  %s2279_s23 = scalar_lea.hbm %s3476_s4, 5632 }
 0x2b7   : > { %p2276_p4 = scmp.ne.s32.totalorder %s3420_s5, %s2275_s7  ;;  %p2280_p3 = scmp.lt.u32.totalorder %s3420_s5, %s3476_s4 }
 0x2b8   : > { %p2281_p7 = scmp.lt.u32.totalorder %s2279_s23, %s2275_s7  ;;  %p2283_p2 = scmp.lt.u32.totalorder %s2275_s7, %s3420_s5 }
 0x2b9   : > { %p2277_p11 = pnand %p2276_p4, %p2470_p12 }
 0x2ba   : > { %p2282_p9 = por %p2281_p7, %p2280_p3 }
 0x2bb   : > { %p2278_p13 = pneg %p2277_p11 }
 0x2bc   : > { %p2284_p5 = por %p2283_p2, %p2282_p9 }
 0x2be   : > { %p2285_p1 = pnand %p2284_p5, %p2278_p13 }
 0x2c0   : > { %2288 = shalt.err (!%p2285_p1)
}
 0x2c1   : > { %1939 = dma.vmem_to_hbm [thread:$0]  (%p2470_p12), %s3424_s14, 2816, %s3420_s5, %s1524_s28, %s2351_s9, %s2351_s9, %s2352_s10  }
 0x2c2 PF: > { %s1569_s21 = sand.u32 1, %s2327_s15   ;;  %p3546_p6 = scmp.ne.s32.totalorder %s3500_s22, 0 }
 0x2c3   : > { %p3547_p8 = scmp.ge.s32.totalorder %s2339_s18, 2  ;;  %s1570_s8 = scalar_lea.sflag [#allocation5], %s1569_s21 }
 0x2c5   : > { %p1954_p10 = pnand %p3547_p8, %p3546_p6 }
 0x2c7   : > { %2318 = dma.done.wait (!%p1954_p10), %s1570_s8, 5632  }
 0x2c8   : > { %2320 = vsyncadd (!%p1954_p10), %s1570_s8, 4294961664  ;;  %s1579_s30 = scalar_lea.sflag [#allocation11], %s1569_s21 }
 0x2c9   : > { %2322 = dma.done.wait (!%p1954_p10), %s1579_s30, 2816  }
 0x2ca   : > { %2324 = vsyncadd (!%p1954_p10), %s1579_s30, 4294964480  ;;  %p24_p12 = scmp.ge.s32.totalorder %s2435_s27, 4   ;;  %s3548_s15 = smov %s2331_s16 }
 0x2cb   : > { %s3549_s16 = smov %s2335_s17  ;;  %s3550_s17 = smov %s2466_s24 }
 0x2cc   : > { %s3551_s18 = smov %s2435_s27  ;;  %26 = sbr.rel (!%p24_p12) target bundleno = 12 (0xc), region = 111 }
 0x2d3   :  { %1584 = vsyncpa [#allocation4], 1 }
 0x2d4   :  { %1586 = vsyncpa [#allocation4 + $0x1], 1 }
 0x2d5   :  { %1587 = vsyncpa [#allocation7], 1 }
 0x2d6   :  { %1589 = vsyncpa [#allocation7 + $0x1], 1 }
 0x2d7   :  { %1590 = vsyncpa [#allocation5], 1 }
 0x2d8   :  { %1592 = vsyncpa [#allocation5 + $0x1], 1 }
 0x2d9   :  { %1593 = vsyncpa [#allocation11], 1 }
 0x2da   :  { %1595 = vsyncpa [#allocation11 + $0x1], 1 }

</bundles_post_ra>
